<compile_context>
chip_gen: v7x
topology: tpu7x:2x2x1
jax: 0.10.0
libtpu: 0.0.40
codegen_flags: <defaults>
</compile_context>

<pallas_src>
import jax
import jax.numpy as jnp
from jax import lax
from jax.experimental import pallas as pl
from jax.experimental.pallas import tpu as pltpu

_MIB = 1024 * 1024


def _vmem_capacity_bytes():
    try:
        return int(pltpu.get_tpu_info().vmem_capacity_bytes)
    except Exception:
        return 64 * _MIB  # conservative default (v7x per-TC VMEM)


def _pick_channel_block(C):
    """Largest multiple of 128 that divides C (lane-dense blocks); else full C."""
    for cb in (512, 384, 256, 128):
        if C % cb == 0:
            return cb
    return C


def _pick_row_block(H, W, CB, itemsize, budget_bytes, prefer_split=False):
    """Largest divisor of H whose (TH, W, CB) block stays within the VMEM budget.

    prefer_split: when the rest of the grid is a single program, prefer a tile
    that gives >= 2 row tiles so both TensorCores (v7x) get work.
    """
    row_bytes = max(1, W * CB * itemsize)
    divisors = [d for d in range(1, H + 1) if H % d == 0]
    fitting = [d for d in divisors if d * row_bytes <= budget_bytes]
    if prefer_split:
        split_ok = [d for d in fitting if d <= H // 2]
        if split_ok and max(split_ok) >= 2:
            return max(split_ok)
    if fitting and max(fitting) >= 2:
        return max(fitting)
    # Avoid degenerate 1-row tiles (halo rows would dominate DMA traffic).
    relaxed = [d for d in divisors if d >= 2 and d * row_bytes <= 4 * budget_bytes]
    if relaxed:
        return max(relaxed)
    return fitting[-1] if fitting else 1


def _dwconv_kernel_factory(TH, W, CB, compute_dtype, out_dtype):
    cdt = jnp.dtype(compute_dtype)
    # XLU-roll path needs aligned (sublane, lane) dims; keep it to f32 math
    # (32-bit layout) and fall back to the concat path otherwise.
    use_roll = (W % 8 == 0) and (CB % 128 == 0) and (cdt == jnp.dtype(jnp.float32))

    def kernel(x_mid_ref, x_top_ref, x_bot_ref, w_ref, b_ref, o_ref):
        # x_mid_ref : (TH, W, CB)  rows [i*TH, i*TH + TH) of the (unpadded) image
        # x_top_ref : (1,  W, CB)  row  i*TH - 1 (clamped at the top border)
        # x_bot_ref : (1,  W, CB)  row  i*TH + TH (clamped at the bottom border)
        # w_ref     : (9, CB)      depthwise weights, tap-major (dy*3 + dx, c)
        # b_ref     : (1, CB)      bias
        # o_ref     : (TH, W, CB)
        i = pl.program_id(2)          # row-tile index (innermost grid axis)
        n_rt = pl.num_programs(2)

        def cast(a):  # skip no-op casts
            return a if a.dtype == cdt else a.astype(cdt)

        mid = cast(x_mid_ref[...])
        # Zero the halo rows at the image border (padding = 1 semantics).
        top = cast(x_top_ref[...]) * (i > 0).astype(cdt)
        bot = cast(x_bot_ref[...]) * (i < n_rt - 1).astype(cdt)

        # Vertical neighbours: up[r] = in[r-1], down[r] = in[r+1].
        # Leading-dim slices/concat only (vreg-aligned, no full-tile copies).
        if TH > 1:
            up = jnp.concatenate([top, mid[:TH - 1]], axis=0)
            down = jnp.concatenate([mid[1:], bot], axis=0)
        else:
            up, down = top, bot

        w = cast(w_ref[...])                       # (9, CB)
        bias = cast(b_ref[...]).reshape(1, 1, CB)  # broadcast over (TH, W)

        def tap(t):
            return w[t][None, None, :]             # (1, 1, CB)

        # Group the 9 taps by horizontal offset dx; the bias seeds the center
        # accumulator (no zeros init + extra add).
        s0 = tap(0) * up + tap(3) * mid + tap(6) * down           # dx = -1
        s1 = tap(1) * up + tap(4) * mid + tap(7) * down + bias    # dx =  0
        s2 = tap(2) * up + tap(5) * mid + tap(8) * down           # dx = +1

        if W == 1:
            o_ref[...] = s1.astype(out_dtype)
            return

        # out[x] = s0[x-1] + s1[x] + s2[x+1], zero columns at the W border.
        if use_roll:
            def hshift(s, shift):
                # Flatten to 2D so the rotate is a plain aligned sublane
                # rotation on the XLU; wrapped values only land in the border
                # columns, which the masks below zero out.
                flat = s.reshape(TH * W, CB)
                return pltpu.roll(flat, shift % (TH * W), 0).reshape(TH, W, CB)

            col = lax.broadcasted_iota(jnp.int32, (TH, W, CB), 1)
            left = jnp.where(col > 0, hshift(s0, 1), 0.0)
            right = jnp.where(col < W - 1, hshift(s2, -1), 0.0)
        else:
            zcol = jnp.zeros((TH, 1, CB), cdt)
            left = jnp.concatenate([zcol, s0[:, :W - 1, :]], axis=1)
            right = jnp.concatenate([s2[:, 1:, :], zcol], axis=1)

        o_ref[...] = (left + s1 + right).astype(out_dtype)

    return kernel


def dwconv_pallas(x, weight, bias, H, W, *, row_block=None, channel_block=None,
                  compute_dtype=None):
    """x: (B, N, C), N == H*W. weight: (C, 1, 3, 3) (PyTorch layout). bias: (C,)."""
    B, N, C = x.shape
    assert N == H * W
    out_dtype = x.dtype
    itemsize = jnp.dtype(x.dtype).itemsize

    if compute_dtype is None:
        compute_dtype = (x.dtype if x.dtype in (jnp.dtype(jnp.float32),
                                                jnp.dtype(jnp.bfloat16))
                         else jnp.float32)
    compute_dtype = jnp.dtype(compute_dtype)
    cdt_itemsize = compute_dtype.itemsize

    # (B, N, C) -> (B, H, W, C): free reshape, no padding pass over HBM.
    x_nhwc = x.reshape(B, H, W, C)
    # (C, 1, 3, 3) -> (9, C): tap-major, channels on lanes.
    w_taps = jnp.transpose(weight[:, 0, :, :], (1, 2, 0)).reshape(9, C)
    w_taps = w_taps.astype(compute_dtype)
    b_row = bias.reshape(1, C).astype(compute_dtype)

    CB = channel_block if channel_block is not None else _pick_channel_block(C)
    assert C % CB == 0, "channel block must divide C"
    n_cb = C // CB

    vmem_cap = _vmem_capacity_bytes()
    # Tile budget: big enough that the 2/TH halo re-read + per-step overhead
    # are negligible, small enough that pipeline buffers + in-kernel
    # temporaries leave headroom even on v7x's 64 MiB VMEM.
    budget = min(max(vmem_cap // 24, 2 * _MIB), 6 * _MIB)
    if row_block is not None:
        TH = row_block
    else:
        TH = _pick_row_block(H, W, CB, itemsize, budget,
                             prefer_split=(B * n_cb < 2))
    assert H % TH == 0, "row block must divide H"
    n_rt = H // TH

    # Right-size the scoped-VMEM request: 2x double-buffered (in tile + out
    # tile + 2 halo rows + weights) plus ~6 tile-sized in-kernel temporaries
    # plus fixed headroom, clamped well below physical VMEM.
    tile_bytes = TH * W * CB * itemsize
    halo_bytes = W * CB * itemsize
    wb_bytes = 10 * CB * cdt_itemsize
    tmp_bytes = 6 * TH * W * CB * cdt_itemsize
    need = 4 * tile_bytes + 4 * halo_bytes + 2 * wb_bytes + tmp_bytes + 4 * _MIB
    vmem_limit = int(min(max(need, 16 * _MIB),
                         max(vmem_cap - 8 * _MIB, 16 * _MIB)))

    kernel = _dwconv_kernel_factory(TH, W, CB, compute_dtype, out_dtype)

    out = pl.pallas_call(
        kernel,
        out_shape=jax.ShapeDtypeStruct((B, H, W, C), out_dtype),
        grid_spec=pltpu.PrefetchScalarGridSpec(
            num_scalar_prefetch=0,
            # Row tiles innermost -> weight/bias blocks (indexed only by c)
            # are not re-fetched every grid step.
            grid=(B, n_cb, n_rt),
            in_specs=[
                # main tile
                pl.BlockSpec((pl.Squeezed(), TH, W, CB),
                             lambda b, c, i: (b, i, 0, c)),
                # halo row above the tile (clamped; masked in-kernel at i == 0)
                pl.BlockSpec((pl.Squeezed(), 1, W, CB),
                             lambda b, c, i: (b, jnp.maximum(i * TH - 1, 0), 0, c)),
                # halo row below the tile (clamped; masked in-kernel at last i)
                pl.BlockSpec((pl.Squeezed(), 1, W, CB),
                             lambda b, c, i: (b, jnp.minimum(i * TH + TH, H - 1), 0, c)),
                pl.BlockSpec((9, CB), lambda b, c, i: (0, c)),
                pl.BlockSpec((1, CB), lambda b, c, i: (0, c)),
            ],
            out_specs=pl.BlockSpec((pl.Squeezed(), TH, W, CB),
                                   lambda b, c, i: (b, i, 0, c)),
        ),
        compiler_params=pltpu.CompilerParams(
            dimension_semantics=("parallel", "parallel", "parallel"),
            vmem_limit_bytes=vmem_limit,
        ),
        cost_estimate=pl.CostEstimate(
            flops=18 * B * H * W * C,
            transcendentals=0,
            # write + read + halo re-reads (2/TH) + weights/bias
            bytes_accessed=int(itemsize * B * H * W * C * (2.0 + 2.0 / TH)
                               + 10 * C * cdt_itemsize),
        ),
    )(x_nhwc, x_nhwc, x_nhwc, w_taps, b_row)

    return out.reshape(B, N, C)


def dwconv_reference(x, weight, bias, H, W):
    """Pure-JAX reference matching PyTorch nn.Conv2d(groups=C) semantics (NCHW)."""
    B, N, C = x.shape
    x_nchw = jnp.transpose(x, (0, 2, 1)).reshape(B, C, H, W)
    out = lax.conv_general_dilated(
        x_nchw, weight,
        window_strides=(1, 1),
        padding=((1, 1), (1, 1)),
        dimension_numbers=("NCHW", "OIHW", "NCHW"),
        feature_group_count=C,
    ) + bias[None, :, None, None]
    return jnp.transpose(out.reshape(B, C, H * W), (0, 2, 1))


if __name__ == "__main__":
    key = jax.random.PRNGKey(0)

    # --- small config matching the module's toy shapes (concat fallback path) ---
    B, C, H, W = 2, 4, 16, 16
    N = H * W
    kx, kw, kb, k2 = jax.random.split(key, 4)
    x = jax.random.normal(kx, (B, N, C), dtype=jnp.float32)
    bound = 1.0 / (9.0 ** 0.5)  # Conv2d-style fan_in = 1*3*3
    weight = jax.random.uniform(kw, (C, 1, 3, 3), jnp.float32, -bound, bound)
    bias = jax.random.uniform(kb, (C,), jnp.float32, -bound, bound)

    out = dwconv_pallas(x, weight, bias, H, W)
    out = jax.block_until_ready(out)
    ref = dwconv_reference(x, weight, bias, H, W)
    assert out.shape == (B, N, C)
    assert jnp.allclose(out, ref, atol=1e-5, rtol=1e-5), "mismatch vs reference (toy)"

    # --- second config: row tiles + channel blocks + halo masking + XLU roll ---
    B2, C2, H2, W2 = 1, 256, 16, 16
    N2 = H2 * W2
    kx2, kw2, kb2 = jax.random.split(k2, 3)
    x2 = jax.random.normal(kx2, (B2, N2, C2), dtype=jnp.float32)
    w2 = jax.random.uniform(kw2, (C2, 1, 3, 3), jnp.float32, -bound, bound)
    b2 = jax.random.uniform(kb2, (C2,), jnp.float32, -bound, bound)

    out2 = dwconv_pallas(x2, w2, b2, H2, W2, row_block=8, channel_block=128)
    out2 = jax.block_until_ready(out2)
    ref2 = dwconv_reference(x2, w2, b2, H2, W2)
    assert jnp.allclose(out2, ref2, atol=1e-5, rtol=1e-5), "mismatch vs reference (tiled)"

    print("KERNEL_OK")
</pallas_src>

<mosaic_0001>
module attributes {stable_mosaic.version = 11 : i64} {
  func.func @kernel(%arg0: i32, %arg1: i32, %arg2: i32, %arg3: memref<1x16x16x4xf32, #tpu.memory_space<vmem>>, %arg4: memref<1x1x16x4xf32, #tpu.memory_space<vmem>>, %arg5: memref<1x1x16x4xf32, #tpu.memory_space<vmem>>, %arg6: memref<9x4xf32, #tpu.memory_space<vmem>>, %arg7: memref<1x4xf32, #tpu.memory_space<vmem>>, %arg8: memref<1x16x16x4xf32, #tpu.memory_space<vmem>>) attributes {dimension_semantics = [#tpu.dimension_semantics<parallel>, #tpu.dimension_semantics<parallel>, #tpu.dimension_semantics<parallel>], iteration_bounds = array<i64: 2, 1, 1>, scalar_prefetch = 0 : i64, scratch_operands = 0 : i64, tpu.core_type = #tpu.core_type<tc>, window_params = [{transform_indices = @transform_0, window_bounds = array<i64: 1, 16, 16, 4>}, {transform_indices = @transform_1, window_bounds = array<i64: 1, 1, 16, 4>}, {transform_indices = @transform_2, window_bounds = array<i64: 1, 1, 16, 4>}, {transform_indices = @transform_3, window_bounds = array<i64: 9, 4>}, {transform_indices = @transform_4, window_bounds = array<i64: 1, 4>}, {transform_indices = @transform_5, window_bounds = array<i64: 1, 16, 16, 4>}]} {
    %c0 = arith.constant 0 : index
    %c0_0 = arith.constant 0 : index
    %c0_1 = arith.constant 0 : index
    %c0_2 = arith.constant 0 : index
    %0 = vector.load %arg3[%c0, %c0_0, %c0_1, %c0_2] : memref<1x16x16x4xf32, #tpu.memory_space<vmem>>, vector<1x16x16x4xf32>
    %1 = vector.shape_cast %0 : vector<1x16x16x4xf32> to vector<16x16x4xf32>
    %c0_3 = arith.constant 0 : index
    %c0_4 = arith.constant 0 : index
    %c0_5 = arith.constant 0 : index
    %c0_6 = arith.constant 0 : index
    %2 = vector.load %arg4[%c0_3, %c0_4, %c0_5, %c0_6] : memref<1x1x16x4xf32, #tpu.memory_space<vmem>>, vector<1x1x16x4xf32>
    %3 = vector.shape_cast %2 : vector<1x1x16x4xf32> to vector<1x16x4xf32>
    %c0_i32 = arith.constant 0 : i32
    %4 = arith.cmpi sgt, %arg2, %c0_i32 : i32
    %5 = arith.extui %4 : i1 to i32
    %6 = arith.sitofp %5 : i32 to f32
    %7 = vector.broadcast %6 : f32 to vector<1x16x4xf32>
    %8 = arith.mulf %3, %7 : vector<1x16x4xf32>
    %c0_7 = arith.constant 0 : index
    %c0_8 = arith.constant 0 : index
    %c0_9 = arith.constant 0 : index
    %c0_10 = arith.constant 0 : index
    %9 = vector.load %arg5[%c0_7, %c0_8, %c0_9, %c0_10] : memref<1x1x16x4xf32, #tpu.memory_space<vmem>>, vector<1x1x16x4xf32>
    %10 = vector.shape_cast %9 : vector<1x1x16x4xf32> to vector<1x16x4xf32>
    %c0_i32_11 = arith.constant 0 : i32
    %11 = arith.cmpi slt, %arg2, %c0_i32_11 : i32
    %12 = arith.extui %11 : i1 to i32
    %13 = arith.sitofp %12 : i32 to f32
    %14 = vector.broadcast %13 : f32 to vector<1x16x4xf32>
    %15 = arith.mulf %10, %14 : vector<1x16x4xf32>
    %16 = vector.extract_strided_slice %1 {offsets = [0, 0, 0], sizes = [15, 16, 4], strides = [1, 1, 1]} : vector<16x16x4xf32> to vector<15x16x4xf32>
    %17 = tpu.concatenate %8, %16 in 0 : vector<1x16x4xf32>, vector<15x16x4xf32> -> vector<16x16x4xf32>
    %18 = vector.extract_strided_slice %1 {offsets = [1, 0, 0], sizes = [15, 16, 4], strides = [1, 1, 1]} : vector<16x16x4xf32> to vector<15x16x4xf32>
    %19 = tpu.concatenate %18, %15 in 0 : vector<15x16x4xf32>, vector<1x16x4xf32> -> vector<16x16x4xf32>
    %c0_12 = arith.constant 0 : index
    %c0_13 = arith.constant 0 : index
    %20 = vector.load %arg6[%c0_12, %c0_13] : memref<9x4xf32, #tpu.memory_space<vmem>>, vector<9x4xf32>
    %c0_14 = arith.constant 0 : index
    %c0_15 = arith.constant 0 : index
    %21 = vector.load %arg7[%c0_14, %c0_15] : memref<1x4xf32, #tpu.memory_space<vmem>>, vector<1x4xf32>
    %22 = vector.shape_cast %21 : vector<1x4xf32> to vector<1x1x4xf32>
    %23 = vector.extract_strided_slice %20 {offsets = [0, 0], sizes = [1, 4], strides = [1, 1]} : vector<9x4xf32> to vector<1x4xf32>
    %24 = vector.shape_cast %23 : vector<1x4xf32> to vector<4xf32>
    %25 = vector.shape_cast %24 : vector<4xf32> to vector<1x1x4xf32>
    %26 = vector.broadcast %25 : vector<1x1x4xf32> to vector<16x16x4xf32>
    %27 = arith.mulf %26, %17 : vector<16x16x4xf32>
    %28 = vector.extract_strided_slice %20 {offsets = [3, 0], sizes = [1, 4], strides = [1, 1]} : vector<9x4xf32> to vector<1x4xf32>
    %29 = vector.shape_cast %28 : vector<1x4xf32> to vector<4xf32>
    %30 = vector.shape_cast %29 : vector<4xf32> to vector<1x1x4xf32>
    %31 = vector.broadcast %30 : vector<1x1x4xf32> to vector<16x16x4xf32>
    %32 = arith.mulf %31, %1 : vector<16x16x4xf32>
    %33 = arith.addf %27, %32 : vector<16x16x4xf32>
    %34 = vector.extract_strided_slice %20 {offsets = [6, 0], sizes = [1, 4], strides = [1, 1]} : vector<9x4xf32> to vector<1x4xf32>
    %35 = vector.shape_cast %34 : vector<1x4xf32> to vector<4xf32>
    %36 = vector.shape_cast %35 : vector<4xf32> to vector<1x1x4xf32>
    %37 = vector.broadcast %36 : vector<1x1x4xf32> to vector<16x16x4xf32>
    %38 = arith.mulf %37, %19 : vector<16x16x4xf32>
    %39 = arith.addf %33, %38 : vector<16x16x4xf32>
    %40 = vector.extract_strided_slice %20 {offsets = [1, 0], sizes = [1, 4], strides = [1, 1]} : vector<9x4xf32> to vector<1x4xf32>
    %41 = vector.shape_cast %40 : vector<1x4xf32> to vector<4xf32>
    %42 = vector.shape_cast %41 : vector<4xf32> to vector<1x1x4xf32>
    %43 = vector.broadcast %42 : vector<1x1x4xf32> to vector<16x16x4xf32>
    %44 = arith.mulf %43, %17 : vector<16x16x4xf32>
    %45 = vector.extract_strided_slice %20 {offsets = [4, 0], sizes = [1, 4], strides = [1, 1]} : vector<9x4xf32> to vector<1x4xf32>
    %46 = vector.shape_cast %45 : vector<1x4xf32> to vector<4xf32>
    %47 = vector.shape_cast %46 : vector<4xf32> to vector<1x1x4xf32>
    %48 = vector.broadcast %47 : vector<1x1x4xf32> to vector<16x16x4xf32>
    %49 = arith.mulf %48, %1 : vector<16x16x4xf32>
    %50 = arith.addf %44, %49 : vector<16x16x4xf32>
    %51 = vector.extract_strided_slice %20 {offsets = [7, 0], sizes = [1, 4], strides = [1, 1]} : vector<9x4xf32> to vector<1x4xf32>
    %52 = vector.shape_cast %51 : vector<1x4xf32> to vector<4xf32>
    %53 = vector.shape_cast %52 : vector<4xf32> to vector<1x1x4xf32>
    %54 = vector.broadcast %53 : vector<1x1x4xf32> to vector<16x16x4xf32>
    %55 = arith.mulf %54, %19 : vector<16x16x4xf32>
    %56 = arith.addf %50, %55 : vector<16x16x4xf32>
    %57 = vector.broadcast %22 : vector<1x1x4xf32> to vector<16x16x4xf32>
    %58 = arith.addf %56, %57 : vector<16x16x4xf32>
    %59 = vector.extract_strided_slice %20 {offsets = [2, 0], sizes = [1, 4], strides = [1, 1]} : vector<9x4xf32> to vector<1x4xf32>
    %60 = vector.shape_cast %59 : vector<1x4xf32> to vector<4xf32>
    %61 = vector.shape_cast %60 : vector<4xf32> to vector<1x1x4xf32>
    %62 = vector.broadcast %61 : vector<1x1x4xf32> to vector<16x16x4xf32>
    %63 = arith.mulf %62, %17 : vector<16x16x4xf32>
    %64 = vector.extract_strided_slice %20 {offsets = [5, 0], sizes = [1, 4], strides = [1, 1]} : vector<9x4xf32> to vector<1x4xf32>
    %65 = vector.shape_cast %64 : vector<1x4xf32> to vector<4xf32>
    %66 = vector.shape_cast %65 : vector<4xf32> to vector<1x1x4xf32>
    %67 = vector.broadcast %66 : vector<1x1x4xf32> to vector<16x16x4xf32>
    %68 = arith.mulf %67, %1 : vector<16x16x4xf32>
    %69 = arith.addf %63, %68 : vector<16x16x4xf32>
    %70 = vector.extract_strided_slice %20 {offsets = [8, 0], sizes = [1, 4], strides = [1, 1]} : vector<9x4xf32> to vector<1x4xf32>
    %71 = vector.shape_cast %70 : vector<1x4xf32> to vector<4xf32>
    %72 = vector.shape_cast %71 : vector<4xf32> to vector<1x1x4xf32>
    %73 = vector.broadcast %72 : vector<1x1x4xf32> to vector<16x16x4xf32>
    %74 = arith.mulf %73, %19 : vector<16x16x4xf32>
    %75 = arith.addf %69, %74 : vector<16x16x4xf32>
    %cst = arith.constant 0.000000e+00 : f32
    %76 = vector.broadcast %cst : f32 to vector<16x1x4xf32>
    %77 = vector.extract_strided_slice %39 {offsets = [0, 0, 0], sizes = [16, 15, 4], strides = [1, 1, 1]} : vector<16x16x4xf32> to vector<16x15x4xf32>
    %78 = tpu.concatenate %76, %77 in 1 : vector<16x1x4xf32>, vector<16x15x4xf32> -> vector<16x16x4xf32>
    %79 = vector.extract_strided_slice %75 {offsets = [0, 1, 0], sizes = [16, 15, 4], strides = [1, 1, 1]} : vector<16x16x4xf32> to vector<16x15x4xf32>
    %80 = tpu.concatenate %79, %76 in 1 : vector<16x15x4xf32>, vector<16x1x4xf32> -> vector<16x16x4xf32>
    %81 = arith.addf %78, %58 : vector<16x16x4xf32>
    %82 = arith.addf %81, %80 : vector<16x16x4xf32>
    %c0_16 = arith.constant 0 : index
    %c0_17 = arith.constant 0 : index
    %c0_18 = arith.constant 0 : index
    %c0_19 = arith.constant 0 : index
    %83 = vector.load %arg8[%c0_16, %c0_17, %c0_18, %c0_19] : memref<1x16x16x4xf32, #tpu.memory_space<vmem>>, vector<1x16x16x4xf32>
    %84 = vector.shape_cast %83 : vector<1x16x16x4xf32> to vector<16x16x4xf32>
    %85 = vector.shape_cast %82 : vector<16x16x4xf32> to vector<1x16x16x4xf32>
    tpu.vector_store %arg8[%c0_16, %c0_17, %c0_18, %c0_19], %85 {strides = array<i32>} : memref<1x16x16x4xf32, #tpu.memory_space<vmem>>, vector<1x16x16x4xf32>,
    return
  }
  func.func @transform_0(%arg0: i32, %arg1: i32, %arg2: i32) -> (i32, i32, i32, i32) {
    %c0_i32 = arith.constant 0 : i32
    %c0_i32_0 = arith.constant 0 : i32
    return %arg0, %arg2, %c0_i32, %arg1 : i32, i32, i32, i32
  }
  func.func @transform_1(%arg0: i32, %arg1: i32, %arg2: i32) -> (i32, i32, i32, i32) {
    %c16_i32 = arith.constant 16 : i32
    %0 = arith.muli %arg2, %c16_i32 : i32
    %c1_i32 = arith.constant 1 : i32
    %1 = arith.subi %0, %c1_i32 : i32
    %c0_i32 = arith.constant 0 : i32
    %2 = arith.maxsi %1, %c0_i32 : i32
    %c0_i32_0 = arith.constant 0 : i32
    %c0_i32_1 = arith.constant 0 : i32
    return %arg0, %2, %c0_i32_0, %arg1 : i32, i32, i32, i32
  }
  func.func @transform_2(%arg0: i32, %arg1: i32, %arg2: i32) -> (i32, i32, i32, i32) {
    %c16_i32 = arith.constant 16 : i32
    %0 = arith.muli %arg2, %c16_i32 : i32
    %c16_i32_0 = arith.constant 16 : i32
    %1 = arith.addi %0, %c16_i32_0 : i32
    %c15_i32 = arith.constant 15 : i32
    %2 = arith.minsi %1, %c15_i32 : i32
    %c0_i32 = arith.constant 0 : i32
    %c0_i32_1 = arith.constant 0 : i32
    return %arg0, %2, %c0_i32, %arg1 : i32, i32, i32, i32
  }
  func.func @transform_3(%arg0: i32, %arg1: i32, %arg2: i32) -> (i32, i32) {
    %c0_i32 = arith.constant 0 : i32
    %c0_i32_0 = arith.constant 0 : i32
    return %c0_i32, %arg1 : i32, i32
  }
  func.func @transform_4(%arg0: i32, %arg1: i32, %arg2: i32) -> (i32, i32) {
    %c0_i32 = arith.constant 0 : i32
    %c0_i32_0 = arith.constant 0 : i32
    return %c0_i32, %arg1 : i32, i32
  }
  func.func @transform_5(%arg0: i32, %arg1: i32, %arg2: i32) -> (i32, i32, i32, i32) {
    %c0_i32 = arith.constant 0 : i32
    %c0_i32_0 = arith.constant 0 : i32
    return %arg0, %arg2, %c0_i32, %arg1 : i32, i32, i32, i32
  }
}

</mosaic_0001>

<bundles_post_ra>
// kernel: tpu_custom_call.1
= control target key start
LH: loop header
LB: loop body
LE: loop exit
PB: predicated region body
PF: predicated region fallthrough
CT: control target
= control target key end

     0   :  { %s1724_s18 = smov 0   ;;  %s1726_s19 = smov 0   ;;  %s2632_s0 = inlined_call_operand.vmem [shape: f32[2,16,16,4], index: 0, kind: input, shape index: {}]   ;;  %s2633_s1 = inlined_call_operand.vmem [shape: f32[2,16,16,4], index: 1, kind: input, shape index: {}]   ;;  %s2634_s2 = inlined_call_operand.vmem [shape: f32[2,16,16,4], index: 2, kind: input, shape index: {}]   ;;  %s2635_s3 = inlined_call_operand.vmem [shape: f32[9,4], index: 3, kind: input, shape index: {}]   ;;  %s2636_s4 = inlined_call_operand.vmem [shape: f32[1,4], index: 4, kind: input, shape index: {}]   ;;  %s2637_s5 = inlined_call_operand.vmem [shape: f32[2,16,16,4], index: 5, kind: output, shape index: {}]  }
   0x1   :  { %s1728_s20 = smov 0  }
   0x2 LB: > { %s34_s21 = sadd.s32 1, %s1688_s19  ;;  %p1625_p0 = scmp.ge.s32.totalorder %s1692_s20, 1  ;;  %s1692_s20 = sphi %s1728_s20, %s15_s20   ;;  %s1688_s19 = sphi %s1726_s19, %s2639_s19   ;;  %s1684_s18 = sphi %s1724_s18, %s2638_s18  }
   0x3   : > { %p36_p1 = scmp.ge.s32.totalorder %s34_s21, 2  ;;  %p314_p2 = scmp.lt.s32.totalorder %s1692_s20, 3 }
   0x5   : > { %s2641_s21 = smov (%p36_p1, %s34_s21), 0  ;;  %p315_p3 = pnand %p1625_p0, %p314_p2 }
   0x6   : > { %p398_p4 = scmp.lt.s32.totalorder (!%p315_p3), %s1684_s18, 1  ;;  %v523_v0 = vlaneseq (!%p315_p3)  ;;  %v520_v2 = vld [vmem:[%s2635_s3] sm:$0xff] (!%p315_p3)  ;;  %vm1109_vm0 = vcmask (!%p315_p3), 1040384   ;;  %vm1238_vm1 = vcmask (!%p315_p3), 1046528   ;;  %v1785_v26 = vld [vmem:[%s2635_s3 + $0x8] ss:$0 sm:$0xff] (!%p315_p3) }
   0x7   : > { %318 = sbr.rel (%p315_p3) target bundleno = 203 (0xcb), region = 40  ;;  %vm1399_vm2 = vcmask (!%p315_p3), 31744   ;;  %v1816_v46 = vld [vmem:[%s2636_s4] ss:$0 sm:$0xff] (!%p315_p3) }
   0x8   : > { %v524_v1 = vshrl.u32 (!%p315_p3), %v523_v0, 7 }
   0xa   : > { %v525_v3 = vsub.s32 (!%p315_p3), 0, %v524_v1  ;;  %v561_v4 = vsub.s32 (!%p315_p3), 3, %v524_v1  ;;  %v629_v5 = vsub.s32 (!%p315_p3), 6, %v524_v1  ;;  %v697_v6 = vsub.s32 (!%p315_p3), 1, %v524_v1 }
   0xb   : > { %v733_v7 = vsub.s32 (!%p315_p3), 4, %v524_v1  ;;  %v801_v8 = vsub.s32 (!%p315_p3), 7, %v524_v1  ;;  %v907_v9 = vsub.s32 (!%p315_p3), 2, %v524_v1  ;;  %v943_v10 = vsub.s32 (!%p315_p3), 5, %v524_v1 }
   0xc   : > { %v1760_v12 = vrot.slane (!%p315_p3), %v520_v2, %v525_v3  ;;  %v1762_v13 = vrot.slane (!%p315_p3), %v520_v2, %v561_v4  ;;  %v1764_v14 = vrot.slane (!%p315_p3), %v520_v2, %v629_v5  ;;  %v1766_v15 = vrot.slane (!%p315_p3), %v520_v2, %v697_v6 }
   0xd   : > { %v1771_v19 = vrot.slane (!%p315_p3), %v520_v2, %v733_v7  ;;  %v1773_v20 = vrot.slane (!%p315_p3), %v520_v2, %v801_v8  ;;  %v1775_v21 = vrot.slane (!%p315_p3), %v520_v2, %v907_v9  ;;  %v1777_v22 = vrot.slane (!%p315_p3), %v520_v2, %v943_v10 }
   0xe   : > { %s2643_s18 = smov (!%p398_p4, %s1684_s18), 1 }
   0xf   : > { %s1745_s24 = sshll.u32 %s2643_s18, 8 }
  0x10   : > { %s1751_s27 = scalar_lea.vmem %s2632_s0, %s1745_s24  ;;  %s426_s30 = scalar_lea.vmem %s2633_s1, %s1745_s24 }
  0x11   : > { %v1758_v11 = vld [vmem:[%s1751_s27] sm:$0xff]  ;;  %v1769_v16 = vld [vmem:[%s1751_s27 + $0x10] sm:$0xff]  ;;  %v505_v18 = vld [vmem:[%s426_s30 + $0x8] sm:$0xff]  ;;  %s1846_s12 = scalar_lea.vmem %s2637_s5, %s1745_s24  ;;  %s1641_s17 = sadd.s32 240, %s1745_s24 }
  0x12   : > { %v504_v17 = vld [vmem:[%s426_s30] sm:$0xff]  ;;  %v1780_v23 = vld [vmem:[%s1751_s27 + $0x8] sm:$0xff]  ;;  %v511_v25 = vmul.f32 0.0, %v505_v18  ;;  %v563_v27 = vmul.f32 %v1762_v13, %v1758_v11  ;;  %v631_v28 = vmul.f32 %v1764_v14, %v1769_v16  ;;  %v735_v29 = vmul.f32 %v1771_v19, %v1758_v11  ;;  %v1800_v33 = vld [vmem:[%s1751_s27 + $0x18] sm:$0xff]  ;;  %s446_s23 = scalar_lea.vmem %s2634_s2, %s1641_s17 }
  0x13   : > { %v510_v24 = vmul.f32 0.0, %v504_v17  ;;  %v803_v30 = vmul.f32 %v1773_v20, %v1769_v16  ;;  %v945_v31 = vmul.f32 %v1777_v22, %v1758_v11  ;;  %v946_v32 = vmul.f32 %v1777_v22, %v1780_v23  ;;  %v1829_v63 = vld [vmem:[%s1751_s27 + $0x20] sm:$0xff] }
  0x14   : > { %v910_v37 = vmul.f32 %v1775_v21, %v511_v25  ;;  %v1013_v38 = vmul.f32 %v1785_v26, %v1769_v16  ;;  %v1014_v39 = vmul.f32 %v1785_v26, %v1800_v33  ;;  %v528_v40 = vmul.f32 %v1760_v12, %v511_v25 }
  0x15   : > { %v527_v34 = vmul.f32 %v1760_v12, %v510_v24  ;;  %v699_v35 = vmul.f32 %v1766_v15, %v510_v24  ;;  %v909_v36 = vmul.f32 %v1775_v21, %v510_v24  ;;  %v564_v41 = vmul.f32 %v1762_v13, %v1780_v23 }
  0x16   : > { %v978_v45 = vadd.f32 %v946_v32, %v910_v37  ;;  %v632_v48 = vmul.f32 %v1764_v14, %v1800_v33  ;;  %v700_v49 = vmul.f32 %v1766_v15, %v511_v25  ;;  %v736_v50 = vmul.f32 %v1771_v19, %v1780_v23 }
  0x17   : > { %v595_v42 = vadd.f32 %v563_v27, %v527_v34  ;;  %v767_v43 = vadd.f32 %v735_v29, %v699_v35  ;;  %v977_v44 = vadd.f32 %v945_v31, %v909_v36  ;;  %v596_v47 = vadd.f32 %v564_v41, %v528_v40 }
  0x18   : > { %v1046_v54 = vadd.f32 %v1014_v39, %v978_v45  ;;  %v768_v56 = vadd.f32 %v736_v50, %v700_v49  ;;  %v804_v57 = vmul.f32 %v1773_v20, %v1800_v33  ;;  %v529_v58 = vmul.f32 %v1760_v12, %v1758_v11 }
  0x19   : > { %v663_v51 = vadd.f32 %v631_v28, %v595_v42  ;;  %v835_v52 = vadd.f32 %v803_v30, %v767_v43  ;;  %v1045_v53 = vadd.f32 %v1013_v38, %v977_v44  ;;  %v664_v55 = vadd.f32 %v632_v48, %v596_v47  ;;  %v1857_v30 = vld [vmem:[%s1751_s27 + $0x28] sm:$0xff] }
  0x1a   : > { %v1240_v62 = vrot.slane %v1046_v54, 1  ;;  %v836_v0 = vadd.f32 %v804_v57, %v768_v56  ;;  %v565_v2 = vmul.f32 %v1762_v13, %v1769_v16  ;;  %v633_v3 = vmul.f32 %v1764_v14, %v1829_v63  ;;  %v1886_v56 = vld [vmem:[%s1751_s27 + $0x30] sm:$0xff] }
  0x1b   : > { %v873_v59 = vadd.f32 %v1816_v46, %v835_v52  ;;  %v1110_v60 = vrot.slane %v663_v51, 7  ;;  %v1239_v61 = vrot.slane %v1045_v53, 1  ;;  %v1111_v1 = vrot.slane %v664_v55, 7 }
  0x1c   : > { %v1319_v6 = vsel %vm1238_vm1, %v1240_v62, 0.0  ;;  %v701_v7 = vmul.f32 %v1766_v15, %v1758_v11  ;;  %v874_v9 = vadd.f32 %v1816_v46, %v836_v0  ;;  %v597_v17 = vadd.f32 %v565_v2, %v529_v58 }
  0x1d   : > { %v1190_v4 = vsel %vm1109_vm0, 0.0, %v1110_v60  ;;  %v1241_v5 = vsel %vm1238_vm1, %v1239_v61, %v1240_v62  ;;  %v1112_v10 = vsel %vm1109_vm0, %v1110_v60, %v1111_v1  ;;  %v737_v18 = vmul.f32 %v1771_v19, %v1769_v16 }
  0x1e   : > { %v1335_v8 = vadd.f32 %v1190_v4, %v873_v59  ;;  %v805_v24 = vmul.f32 %v1773_v20, %v1829_v63  ;;  %v911_v25 = vmul.f32 %v1775_v21, %v1758_v11  ;;  %v912_v27 = vmul.f32 %v1775_v21, %v1780_v23 }
  0x1f   : > { %v1336_v29 = vadd.f32 %v1112_v10, %v874_v9  ;;  %v665_v31 = vadd.f32 %v633_v3, %v597_v17  ;;  %v947_v32 = vmul.f32 %v1777_v22, %v1769_v16  ;;  %v769_v34 = vadd.f32 %v737_v18, %v701_v7 }
  0x20   : > { %v1367_v28 = vadd.f32 %v1335_v8, %v1241_v5  ;;  %v948_v35 = vmul.f32 %v1777_v22, %v1800_v33  ;;  %v1015_v36 = vmul.f32 %v1785_v26, %v1829_v63  ;;  %v1016_v11 = vmul.f32 %v1785_v26, %v1857_v30 }
  0x21   : > { %v1368_v37 = vadd.f32 %v1336_v29, %v1319_v6  ;;  %v979_v38 = vadd.f32 %v947_v32, %v911_v25  ;;  %v1113_v39 = vrot.slane %v665_v31, 7  ;;  %v530_v40 = vmul.f32 %v1760_v12, %v1780_v23 }
  0x22   : > { %1400 = vst.msk [vmem:[%s1846_s12] sm:$0xff] %vm1399_vm2, %v1367_v28  ;;  %v837_v41 = vadd.f32 %v805_v24, %v769_v34  ;;  %v980_v42 = vadd.f32 %v948_v35, %v912_v27  ;;  %v566_v43 = vmul.f32 %v1762_v13, %v1800_v33  ;;  %v634_v44 = vmul.f32 %v1764_v14, %v1857_v30  ;;  %v1913_v28 = vld [vmem:[%s1751_s27 + $0x38] sm:$0xff] }
  0x23   : > { %1401 = vst.msk [vmem:[%s1846_s12 + $0x8] sm:$0xff] %vm1399_vm2, %v1368_v37  ;;  %v1047_v45 = vadd.f32 %v1015_v36, %v979_v38  ;;  %v1191_v47 = vsel %vm1109_vm0, 0.0, %v1113_v39  ;;  %v702_v48 = vmul.f32 %v1766_v15, %v1780_v23  ;;  %v738_v49 = vmul.f32 %v1771_v19, %v1800_v33 }
  0x24   : > { %v875_v50 = vadd.f32 %v1816_v46, %v837_v41  ;;  %v1048_v51 = vadd.f32 %v1016_v11, %v980_v42  ;;  %v598_v52 = vadd.f32 %v566_v43, %v530_v40  ;;  %v806_v53 = vmul.f32 %v1773_v20, %v1857_v30 }
  0x25   : > { %v1242_v54 = vrot.slane %v1047_v45, 1  ;;  %v770_v55 = vadd.f32 %v738_v49, %v702_v48  ;;  %v531_v57 = vmul.f32 %v1760_v12, %v1769_v16  ;;  %v567_v23 = vmul.f32 %v1762_v13, %v1829_v63 }
  0x26   : > { %v1243_v58 = vrot.slane %v1048_v51, 1  ;;  %v1337_v59 = vadd.f32 %v1191_v47, %v875_v50  ;;  %v666_v60 = vadd.f32 %v634_v44, %v598_v52  ;;  %v635_v61 = vmul.f32 %v1764_v14, %v1886_v56  ;;  %v1938_v51 = vld [vmem:[%s1751_s27 + $0x40] sm:$0xff] }
  0x27   : > { %v838_v62 = vadd.f32 %v806_v53, %v770_v55  ;;  %v599_v0 = vadd.f32 %v567_v23, %v531_v57  ;;  %v703_v1 = vmul.f32 %v1766_v15, %v1769_v16  ;;  %v739_v2 = vmul.f32 %v1771_v19, %v1829_v63 }
  0x28   : > { %v1244_v3 = vsel %vm1238_vm1, %v1242_v54, %v1243_v58  ;;  %v1114_v4 = vrot.slane %v666_v60, 7  ;;  %v1320_v5 = vsel %vm1238_vm1, %v1243_v58, 0.0  ;;  %v807_v6 = vmul.f32 %v1773_v20, %v1886_v56 }
  0x29   : > { %v1369_v7 = vadd.f32 %v1337_v59, %v1244_v3  ;;  %v876_v8 = vadd.f32 %v1816_v46, %v838_v62  ;;  %v667_v9 = vadd.f32 %v635_v61, %v599_v0  ;;  %v771_v10 = vadd.f32 %v739_v2, %v703_v1 }
  0x2a   : > { %v1115_v17 = vsel %vm1109_vm0, %v1113_v39, %v1114_v4  ;;  %v913_v18 = vmul.f32 %v1775_v21, %v1769_v16  ;;  %v914_v24 = vmul.f32 %v1775_v21, %v1800_v33  ;;  %v949_v25 = vmul.f32 %v1777_v22, %v1829_v63 }
  0x2b   : > { %1402 = vst.msk [vmem:[%s1846_s12 + $0x10] sm:$0xff] %vm1399_vm2, %v1369_v7  ;;  %v1338_v27 = vadd.f32 %v1115_v17, %v876_v8  ;;  %v839_v29 = vadd.f32 %v807_v6, %v771_v10  ;;  %v950_v31 = vmul.f32 %v1777_v22, %v1857_v30  ;;  %v1017_v32 = vmul.f32 %v1785_v26, %v1886_v56  ;;  %v1959_v8 = vld [vmem:[%s1751_s27 + $0x48] sm:$0xff] }
  0x2c   : > { %v981_v16 = vadd.f32 %v949_v25, %v913_v18  ;;  %v1018_v34 = vmul.f32 %v1785_v26, %v1913_v28  ;;  %v1116_v35 = vrot.slane %v667_v9, 7  ;;  %v532_v36 = vmul.f32 %v1760_v12, %v1800_v33 }
  0x2d   : > { %v1370_v11 = vadd.f32 %v1338_v27, %v1320_v5  ;;  %v877_v37 = vadd.f32 %v1816_v46, %v839_v29  ;;  %v982_v38 = vadd.f32 %v950_v31, %v914_v24  ;;  %v568_v39 = vmul.f32 %v1762_v13, %v1857_v30 }
  0x2e   : > { %v1049_v40 = vadd.f32 %v1017_v32, %v981_v16  ;;  %v1192_v41 = vsel %vm1109_vm0, 0.0, %v1116_v35  ;;  %v636_v42 = vmul.f32 %v1764_v14, %v1913_v28  ;;  %v704_v43 = vmul.f32 %v1766_v15, %v1800_v33 }
  0x2f   : > { %1403 = vst.msk [vmem:[%s1846_s12 + $0x18] sm:$0xff] %vm1399_vm2, %v1370_v11  ;;  %v1050_v44 = vadd.f32 %v1018_v34, %v982_v38  ;;  %v1339_v45 = vadd.f32 %v1192_v41, %v877_v37  ;;  %v600_v47 = vadd.f32 %v568_v39, %v532_v36  ;;  %v740_v48 = vmul.f32 %v1771_v19, %v1857_v30 }
  0x30   : > { %v1245_v49 = vrot.slane %v1049_v40, 1  ;;  %v808_v50 = vmul.f32 %v1773_v20, %v1913_v28  ;;  %v533_v52 = vmul.f32 %v1760_v12, %v1829_v63  ;;  %v569_v33 = vmul.f32 %v1762_v13, %v1886_v56 }
  0x31   : > { %v1246_v53 = vrot.slane %v1050_v44, 1  ;;  %v668_v54 = vadd.f32 %v636_v42, %v600_v47  ;;  %v772_v55 = vadd.f32 %v740_v48, %v704_v43  ;;  %v637_v57 = vmul.f32 %v1764_v14, %v1938_v51 }
  0x32   : > { %v601_v23 = vadd.f32 %v569_v33, %v533_v52  ;;  %v705_v58 = vmul.f32 %v1766_v15, %v1829_v63  ;;  %v741_v59 = vmul.f32 %v1771_v19, %v1886_v56  ;;  %v809_v60 = vmul.f32 %v1773_v20, %v1938_v51 }
  0x33   : > { %v1247_v61 = vsel %vm1238_vm1, %v1245_v49, %v1246_v53  ;;  %v840_v62 = vadd.f32 %v808_v50, %v772_v55  ;;  %v1117_v0 = vrot.slane %v668_v54, 7  ;;  %v1321_v1 = vsel %vm1238_vm1, %v1246_v53, 0.0 }
  0x34   : > { %v1371_v2 = vadd.f32 %v1339_v45, %v1247_v61  ;;  %v669_v3 = vadd.f32 %v637_v57, %v601_v23  ;;  %v773_v4 = vadd.f32 %v741_v59, %v705_v58  ;;  %v915_v5 = vmul.f32 %v1775_v21, %v1829_v63  ;;  %v1990_v45 = vld [vmem:[%s1751_s27 + $0x50] sm:$0xff] }
  0x35   : > { %v878_v6 = vadd.f32 %v1816_v46, %v840_v62  ;;  %v1118_v7 = vsel %vm1109_vm0, %v1116_v35, %v1117_v0  ;;  %v916_v9 = vmul.f32 %v1775_v21, %v1857_v30  ;;  %v951_v10 = vmul.f32 %v1777_v22, %v1886_v56 }
  0x36   : > { %1404 = vst.msk [vmem:[%s1846_s12 + $0x20] sm:$0xff] %vm1399_vm2, %v1371_v2  ;;  %v841_v17 = vadd.f32 %v809_v60, %v773_v4  ;;  %v952_v18 = vmul.f32 %v1777_v22, %v1913_v28  ;;  %v1019_v63 = vmul.f32 %v1785_v26, %v1938_v51  ;;  %v1020_v24 = vmul.f32 %v1785_v26, %v1959_v8 }
  0x37   : > { %v1340_v25 = vadd.f32 %v1118_v7, %v878_v6  ;;  %v983_v27 = vadd.f32 %v951_v10, %v915_v5  ;;  %v1119_v29 = vrot.slane %v669_v3, 7  ;;  %v534_v31 = vmul.f32 %v1760_v12, %v1857_v30  ;;  %v2011_v3 = vld [vmem:[%s1751_s27 + $0x58] sm:$0xff] }
  0x38   : > { %v879_v32 = vadd.f32 %v1816_v46, %v841_v17  ;;  %v984_v16 = vadd.f32 %v952_v18, %v916_v9  ;;  %v570_v34 = vmul.f32 %v1762_v13, %v1913_v28  ;;  %v638_v35 = vmul.f32 %v1764_v14, %v1959_v8 }
  0x39   : > { %v1372_v36 = vadd.f32 %v1340_v25, %v1321_v1  ;;  %v1051_v11 = vadd.f32 %v1019_v63, %v983_v27  ;;  %v1193_v37 = vsel %vm1109_vm0, 0.0, %v1119_v29  ;;  %v706_v38 = vmul.f32 %v1766_v15, %v1857_v30 }
  0x3a   : > { %v1052_v39 = vadd.f32 %v1020_v24, %v984_v16  ;;  %v1341_v40 = vadd.f32 %v1193_v37, %v879_v32  ;;  %v602_v41 = vadd.f32 %v570_v34, %v534_v31  ;;  %v742_v42 = vmul.f32 %v1771_v19, %v1913_v28 }
  0x3b   : > { %1405 = vst.msk [vmem:[%s1846_s12 + $0x28] sm:$0xff] %vm1399_vm2, %v1372_v36  ;;  %v1248_v43 = vrot.slane %v1051_v11, 1  ;;  %v810_v44 = vmul.f32 %v1773_v20, %v1959_v8  ;;  %v535_v47 = vmul.f32 %v1760_v12, %v1886_v56  ;;  %v571_v30 = vmul.f32 %v1762_v13, %v1938_v51 }
  0x3c   : > { %v1249_v48 = vrot.slane %v1052_v39, 1  ;;  %v670_v49 = vadd.f32 %v638_v35, %v602_v41  ;;  %v774_v50 = vadd.f32 %v742_v42, %v706_v38  ;;  %v639_v52 = vmul.f32 %v1764_v14, %v1990_v45 }
  0x3d   : > { %v603_v33 = vadd.f32 %v571_v30, %v535_v47  ;;  %v707_v53 = vmul.f32 %v1766_v15, %v1886_v56  ;;  %v743_v54 = vmul.f32 %v1771_v19, %v1938_v51  ;;  %v811_v55 = vmul.f32 %v1773_v20, %v1990_v45 }
  0x3e   : > { %v1250_v57 = vsel %vm1238_vm1, %v1248_v43, %v1249_v48  ;;  %v842_v23 = vadd.f32 %v810_v44, %v774_v50  ;;  %v1120_v58 = vrot.slane %v670_v49, 7  ;;  %v1322_v59 = vsel %vm1238_vm1, %v1249_v48, 0.0 }
  0x3f   : > { %v1373_v60 = vadd.f32 %v1341_v40, %v1250_v57  ;;  %v671_v61 = vadd.f32 %v639_v52, %v603_v33  ;;  %v775_v62 = vadd.f32 %v743_v54, %v707_v53  ;;  %v917_v0 = vmul.f32 %v1775_v21, %v1886_v56  ;;  %v2042_v40 = vld [vmem:[%s1751_s27 + $0x60] sm:$0xff] }
  0x40   : > { %v880_v1 = vadd.f32 %v1816_v46, %v842_v23  ;;  %v1121_v2 = vsel %vm1109_vm0, %v1119_v29, %v1120_v58  ;;  %v918_v4 = vmul.f32 %v1775_v21, %v1913_v28  ;;  %v953_v5 = vmul.f32 %v1777_v22, %v1938_v51 }
  0x41   : > { %1406 = vst.msk [vmem:[%s1846_s12 + $0x30] sm:$0xff] %vm1399_vm2, %v1373_v60  ;;  %v843_v6 = vadd.f32 %v811_v55, %v775_v62  ;;  %v954_v7 = vmul.f32 %v1777_v22, %v1959_v8  ;;  %v1021_v56 = vmul.f32 %v1785_v26, %v1990_v45  ;;  %v1022_v9 = vmul.f32 %v1785_v26, %v2011_v3 }
  0x42   : > { %v1342_v10 = vadd.f32 %v1121_v2, %v880_v1  ;;  %v985_v17 = vadd.f32 %v953_v5, %v917_v0  ;;  %v1122_v18 = vrot.slane %v671_v61, 7  ;;  %v536_v63 = vmul.f32 %v1760_v12, %v1913_v28  ;;  %v2063_v61 = vld [vmem:[%s1751_s27 + $0x68] sm:$0xff] }
  0x43   : > { %v881_v24 = vadd.f32 %v1816_v46, %v843_v6  ;;  %v986_v25 = vadd.f32 %v954_v7, %v918_v4  ;;  %v572_v27 = vmul.f32 %v1762_v13, %v1959_v8  ;;  %v640_v29 = vmul.f32 %v1764_v14, %v2011_v3 }
  0x44   : > { %v1374_v31 = vadd.f32 %v1342_v10, %v1322_v59  ;;  %v1053_v32 = vadd.f32 %v1021_v56, %v985_v17  ;;  %v1194_v16 = vsel %vm1109_vm0, 0.0, %v1122_v18  ;;  %v708_v34 = vmul.f32 %v1766_v15, %v1913_v28 }
  0x45   : > { %v1054_v35 = vadd.f32 %v1022_v9, %v986_v25  ;;  %v1343_v36 = vadd.f32 %v1194_v16, %v881_v24  ;;  %v604_v11 = vadd.f32 %v572_v27, %v536_v63  ;;  %v744_v37 = vmul.f32 %v1771_v19, %v1959_v8 }
  0x46   : > { %1407 = vst.msk [vmem:[%s1846_s12 + $0x38] sm:$0xff] %vm1399_vm2, %v1374_v31  ;;  %v1251_v38 = vrot.slane %v1053_v32, 1  ;;  %v812_v39 = vmul.f32 %v1773_v20, %v2011_v3  ;;  %v537_v41 = vmul.f32 %v1760_v12, %v1938_v51  ;;  %v573_v28 = vmul.f32 %v1762_v13, %v1990_v45 }
  0x47   : > { %v1252_v42 = vrot.slane %v1054_v35, 1  ;;  %v672_v43 = vadd.f32 %v640_v29, %v604_v11  ;;  %v776_v44 = vadd.f32 %v744_v37, %v708_v34  ;;  %v641_v47 = vmul.f32 %v1764_v14, %v2042_v40 }
  0x48   : > { %v605_v30 = vadd.f32 %v573_v28, %v537_v41  ;;  %v709_v48 = vmul.f32 %v1766_v15, %v1938_v51  ;;  %v745_v49 = vmul.f32 %v1771_v19, %v1990_v45  ;;  %v813_v50 = vmul.f32 %v1773_v20, %v2042_v40 }
  0x49   : > { %v1253_v52 = vsel %vm1238_vm1, %v1251_v38, %v1252_v42  ;;  %v844_v33 = vadd.f32 %v812_v39, %v776_v44  ;;  %v1123_v53 = vrot.slane %v672_v43, 7  ;;  %v1323_v54 = vsel %vm1238_vm1, %v1252_v42, 0.0 }
  0x4a   : > { %v1375_v55 = vadd.f32 %v1343_v36, %v1253_v52  ;;  %v673_v57 = vadd.f32 %v641_v47, %v605_v30  ;;  %v777_v23 = vadd.f32 %v745_v49, %v709_v48  ;;  %v919_v58 = vmul.f32 %v1775_v21, %v1938_v51  ;;  %v2094_v36 = vld [vmem:[%s1751_s27 + $0x70] sm:$0xff] }
  0x4b   : > { %v882_v59 = vadd.f32 %v1816_v46, %v844_v33  ;;  %v1124_v60 = vsel %vm1109_vm0, %v1122_v18, %v1123_v53  ;;  %v920_v62 = vmul.f32 %v1775_v21, %v1959_v8  ;;  %v955_v0 = vmul.f32 %v1777_v22, %v1990_v45 }
  0x4c   : > { %1408 = vst.msk [vmem:[%s1846_s12 + $0x40] sm:$0xff] %vm1399_vm2, %v1375_v55  ;;  %v845_v1 = vadd.f32 %v813_v50, %v777_v23  ;;  %v956_v2 = vmul.f32 %v1777_v22, %v2011_v3  ;;  %v1023_v51 = vmul.f32 %v1785_v26, %v2042_v40  ;;  %v1024_v4 = vmul.f32 %v1785_v26, %v2063_v61 }
  0x4d   : > { %v1344_v5 = vadd.f32 %v1124_v60, %v882_v59  ;;  %v987_v6 = vadd.f32 %v955_v0, %v919_v58  ;;  %v1125_v7 = vrot.slane %v673_v57, 7  ;;  %v538_v56 = vmul.f32 %v1760_v12, %v1959_v8  ;;  %v2115_v57 = vld [vmem:[%s1751_s27 + $0x78] sm:$0xff] }
  0x4e   : > { %v883_v9 = vadd.f32 %v1816_v46, %v845_v1  ;;  %v988_v10 = vadd.f32 %v956_v2, %v920_v62  ;;  %v574_v17 = vmul.f32 %v1762_v13, %v2011_v3  ;;  %v642_v18 = vmul.f32 %v1764_v14, %v2063_v61 }
  0x4f   : > { %v1376_v63 = vadd.f32 %v1344_v5, %v1323_v54  ;;  %v1055_v24 = vadd.f32 %v1023_v51, %v987_v6  ;;  %v1195_v25 = vsel %vm1109_vm0, 0.0, %v1125_v7  ;;  %v710_v27 = vmul.f32 %v1766_v15, %v1959_v8 }
  0x50   : > { %v1056_v29 = vadd.f32 %v1024_v4, %v988_v10  ;;  %v1345_v31 = vadd.f32 %v1195_v25, %v883_v9  ;;  %v606_v32 = vadd.f32 %v574_v17, %v538_v56  ;;  %v746_v16 = vmul.f32 %v1771_v19, %v2011_v3 }
  0x51   : > { %1409 = vst.msk [vmem:[%s1846_s12 + $0x48] sm:$0xff] %vm1399_vm2, %v1376_v63  ;;  %v1254_v34 = vrot.slane %v1055_v24, 1  ;;  %v814_v35 = vmul.f32 %v1773_v20, %v2063_v61  ;;  %v539_v11 = vmul.f32 %v1760_v12, %v1990_v45  ;;  %v575_v8 = vmul.f32 %v1762_v13, %v2042_v40 }
  0x52   : > { %v1255_v37 = vrot.slane %v1056_v29, 1  ;;  %v674_v38 = vadd.f32 %v642_v18, %v606_v32  ;;  %v778_v39 = vadd.f32 %v746_v16, %v710_v27  ;;  %v643_v41 = vmul.f32 %v1764_v14, %v2094_v36 }
  0x53   : > { %v607_v28 = vadd.f32 %v575_v8, %v539_v11  ;;  %v711_v42 = vmul.f32 %v1766_v15, %v1990_v45  ;;  %v747_v43 = vmul.f32 %v1771_v19, %v2042_v40  ;;  %v815_v44 = vmul.f32 %v1773_v20, %v2094_v36 }
  0x54   : > { %v1256_v47 = vsel %vm1238_vm1, %v1254_v34, %v1255_v37  ;;  %v846_v30 = vadd.f32 %v814_v35, %v778_v39  ;;  %v1126_v48 = vrot.slane %v674_v38, 7  ;;  %v1324_v49 = vsel %vm1238_vm1, %v1255_v37, 0.0 }
  0x55   : > { %v1377_v50 = vadd.f32 %v1345_v31, %v1256_v47  ;;  %v675_v52 = vadd.f32 %v643_v41, %v607_v28  ;;  %v779_v33 = vadd.f32 %v747_v43, %v711_v42  ;;  %v921_v53 = vmul.f32 %v1775_v21, %v1990_v45  ;;  %v2146_v31 = vld [vmem:[%s1751_s27 + $0x80] sm:$0xff] }
  0x56   : > { %v884_v54 = vadd.f32 %v1816_v46, %v846_v30  ;;  %v1127_v55 = vsel %vm1109_vm0, %v1125_v7, %v1126_v48  ;;  %v922_v23 = vmul.f32 %v1775_v21, %v2011_v3  ;;  %v957_v58 = vmul.f32 %v1777_v22, %v2042_v40 }
  0x57   : > { %1410 = vst.msk [vmem:[%s1846_s12 + $0x50] sm:$0xff] %vm1399_vm2, %v1377_v50  ;;  %v847_v59 = vadd.f32 %v815_v44, %v779_v33  ;;  %v958_v60 = vmul.f32 %v1777_v22, %v2063_v61  ;;  %v1025_v45 = vmul.f32 %v1785_v26, %v2094_v36  ;;  %v1026_v62 = vmul.f32 %v1785_v26, %v2115_v57 }
  0x58   : > { %v1346_v0 = vadd.f32 %v1127_v55, %v884_v54  ;;  %v989_v1 = vadd.f32 %v957_v58, %v921_v53  ;;  %v1128_v2 = vrot.slane %v675_v52, 7  ;;  %v540_v51 = vmul.f32 %v1760_v12, %v2011_v3  ;;  %v2167_v52 = vld [vmem:[%s1751_s27 + $0x88] sm:$0xff] }
  0x59   : > { %v885_v4 = vadd.f32 %v1816_v46, %v847_v59  ;;  %v990_v5 = vadd.f32 %v958_v60, %v922_v23  ;;  %v576_v6 = vmul.f32 %v1762_v13, %v2063_v61  ;;  %v644_v7 = vmul.f32 %v1764_v14, %v2115_v57 }
  0x5a   : > { %v1378_v56 = vadd.f32 %v1346_v0, %v1324_v49  ;;  %v1057_v9 = vadd.f32 %v1025_v45, %v989_v1  ;;  %v1196_v10 = vsel %vm1109_vm0, 0.0, %v1128_v2  ;;  %v712_v17 = vmul.f32 %v1766_v15, %v2011_v3 }
  0x5b   : > { %v1058_v18 = vadd.f32 %v1026_v62, %v990_v5  ;;  %v1347_v63 = vadd.f32 %v1196_v10, %v885_v4  ;;  %v608_v24 = vadd.f32 %v576_v6, %v540_v51  ;;  %v748_v25 = vmul.f32 %v1771_v19, %v2063_v61 }
  0x5c   : > { %1411 = vst.msk [vmem:[%s1846_s12 + $0x58] sm:$0xff] %vm1399_vm2, %v1378_v56  ;;  %v1257_v27 = vrot.slane %v1057_v9, 1  ;;  %v816_v29 = vmul.f32 %v1773_v20, %v2115_v57  ;;  %v541_v32 = vmul.f32 %v1760_v12, %v2042_v40  ;;  %v577_v3 = vmul.f32 %v1762_v13, %v2094_v36 }
  0x5d   : > { %v1258_v16 = vrot.slane %v1058_v18, 1  ;;  %v676_v34 = vadd.f32 %v644_v7, %v608_v24  ;;  %v780_v35 = vadd.f32 %v748_v25, %v712_v17  ;;  %v645_v11 = vmul.f32 %v1764_v14, %v2146_v31 }
  0x5e   : > { %v609_v8 = vadd.f32 %v577_v3, %v541_v32  ;;  %v713_v37 = vmul.f32 %v1766_v15, %v2042_v40  ;;  %v749_v38 = vmul.f32 %v1771_v19, %v2094_v36  ;;  %v817_v39 = vmul.f32 %v1773_v20, %v2146_v31 }
  0x5f   : > { %v1259_v41 = vsel %vm1238_vm1, %v1257_v27, %v1258_v16  ;;  %v848_v28 = vadd.f32 %v816_v29, %v780_v35  ;;  %v1129_v42 = vrot.slane %v676_v34, 7  ;;  %v1325_v43 = vsel %vm1238_vm1, %v1258_v16, 0.0 }
  0x60   : > { %v1379_v44 = vadd.f32 %v1347_v63, %v1259_v41  ;;  %v677_v47 = vadd.f32 %v645_v11, %v609_v8  ;;  %v781_v30 = vadd.f32 %v749_v38, %v713_v37  ;;  %v923_v48 = vmul.f32 %v1775_v21, %v2042_v40  ;;  %v2198_v63 = vld [vmem:[%s1751_s27 + $0x90] sm:$0xff] }
  0x61   : > { %v886_v49 = vadd.f32 %v1816_v46, %v848_v28  ;;  %v1130_v50 = vsel %vm1109_vm0, %v1128_v2, %v1129_v42  ;;  %v924_v33 = vmul.f32 %v1775_v21, %v2063_v61  ;;  %v959_v53 = vmul.f32 %v1777_v22, %v2094_v36 }
  0x62   : > { %1412 = vst.msk [vmem:[%s1846_s12 + $0x60] sm:$0xff] %vm1399_vm2, %v1379_v44  ;;  %v849_v54 = vadd.f32 %v817_v39, %v781_v30  ;;  %v960_v55 = vmul.f32 %v1777_v22, %v2115_v57  ;;  %v1027_v40 = vmul.f32 %v1785_v26, %v2146_v31  ;;  %v1028_v23 = vmul.f32 %v1785_v26, %v2167_v52 }
  0x63   : > { %v1348_v58 = vadd.f32 %v1130_v50, %v886_v49  ;;  %v991_v59 = vadd.f32 %v959_v53, %v923_v48  ;;  %v1131_v60 = vrot.slane %v677_v47, 7  ;;  %v542_v45 = vmul.f32 %v1760_v12, %v2063_v61  ;;  %v2219_v47 = vld [vmem:[%s1751_s27 + $0x98] sm:$0xff] }
  0x64   : > { %v887_v62 = vadd.f32 %v1816_v46, %v849_v54  ;;  %v992_v0 = vadd.f32 %v960_v55, %v924_v33  ;;  %v578_v1 = vmul.f32 %v1762_v13, %v2115_v57  ;;  %v646_v2 = vmul.f32 %v1764_v14, %v2167_v52 }
  0x65   : > { %v1380_v51 = vadd.f32 %v1348_v58, %v1325_v43  ;;  %v1059_v4 = vadd.f32 %v1027_v40, %v991_v59  ;;  %v1197_v5 = vsel %vm1109_vm0, 0.0, %v1131_v60  ;;  %v714_v6 = vmul.f32 %v1766_v15, %v2063_v61 }
  0x66   : > { %v1060_v7 = vadd.f32 %v1028_v23, %v992_v0  ;;  %v1349_v56 = vadd.f32 %v1197_v5, %v887_v62  ;;  %v610_v9 = vadd.f32 %v578_v1, %v542_v45  ;;  %v750_v10 = vmul.f32 %v1771_v19, %v2115_v57 }
  0x67   : > { %1413 = vst.msk [vmem:[%s1846_s12 + $0x68] sm:$0xff] %vm1399_vm2, %v1380_v51  ;;  %v1260_v17 = vrot.slane %v1059_v4, 1  ;;  %v818_v18 = vmul.f32 %v1773_v20, %v2167_v52  ;;  %v543_v24 = vmul.f32 %v1760_v12, %v2094_v36  ;;  %v579_v61 = vmul.f32 %v1762_v13, %v2146_v31 }
  0x68   : > { %v1261_v25 = vrot.slane %v1060_v7, 1  ;;  %v678_v27 = vadd.f32 %v646_v2, %v610_v9  ;;  %v782_v29 = vadd.f32 %v750_v10, %v714_v6  ;;  %v647_v32 = vmul.f32 %v1764_v14, %v2198_v63 }
  0x69   : > { %v611_v3 = vadd.f32 %v579_v61, %v543_v24  ;;  %v715_v16 = vmul.f32 %v1766_v15, %v2094_v36  ;;  %v751_v34 = vmul.f32 %v1771_v19, %v2146_v31  ;;  %v819_v35 = vmul.f32 %v1773_v20, %v2198_v63 }
  0x6a   : > { %v1262_v11 = vsel %vm1238_vm1, %v1260_v17, %v1261_v25  ;;  %v850_v8 = vadd.f32 %v818_v18, %v782_v29  ;;  %v1132_v37 = vrot.slane %v678_v27, 7  ;;  %v1326_v38 = vsel %vm1238_vm1, %v1261_v25, 0.0 }
  0x6b   : > { %v1381_v39 = vadd.f32 %v1349_v56, %v1262_v11  ;;  %v679_v41 = vadd.f32 %v647_v32, %v611_v3  ;;  %v783_v28 = vadd.f32 %v751_v34, %v715_v16  ;;  %v925_v42 = vmul.f32 %v1775_v21, %v2094_v36  ;;  %v2250_v56 = vld [vmem:[%s1751_s27 + $0xa0] sm:$0xff] }
  0x6c   : > { %v888_v43 = vadd.f32 %v1816_v46, %v850_v8  ;;  %v1133_v44 = vsel %vm1109_vm0, %v1131_v60, %v1132_v37  ;;  %v926_v30 = vmul.f32 %v1775_v21, %v2115_v57  ;;  %v961_v48 = vmul.f32 %v1777_v22, %v2146_v31 }
  0x6d   : > { %1414 = vst.msk [vmem:[%s1846_s12 + $0x70] sm:$0xff] %vm1399_vm2, %v1381_v39  ;;  %v851_v49 = vadd.f32 %v819_v35, %v783_v28  ;;  %v962_v50 = vmul.f32 %v1777_v22, %v2167_v52  ;;  %v1029_v36 = vmul.f32 %v1785_v26, %v2198_v63  ;;  %v1030_v33 = vmul.f32 %v1785_v26, %v2219_v47 }
  0x6e   : > { %v1350_v53 = vadd.f32 %v1133_v44, %v888_v43  ;;  %v993_v54 = vadd.f32 %v961_v48, %v925_v42  ;;  %v1134_v55 = vrot.slane %v679_v41, 7  ;;  %v544_v40 = vmul.f32 %v1760_v12, %v2115_v57  ;;  %v2271_v41 = vld [vmem:[%s1751_s27 + $0xa8] sm:$0xff] }
  0x6f   : > { %v889_v23 = vadd.f32 %v1816_v46, %v851_v49  ;;  %v994_v58 = vadd.f32 %v962_v50, %v926_v30  ;;  %v580_v59 = vmul.f32 %v1762_v13, %v2167_v52  ;;  %v648_v60 = vmul.f32 %v1764_v14, %v2219_v47 }
  0x70   : > { %v1382_v45 = vadd.f32 %v1350_v53, %v1326_v38  ;;  %v1061_v62 = vadd.f32 %v1029_v36, %v993_v54  ;;  %v1198_v0 = vsel %vm1109_vm0, 0.0, %v1134_v55  ;;  %v716_v1 = vmul.f32 %v1766_v15, %v2115_v57 }
  0x71   : > { %v1062_v2 = vadd.f32 %v1030_v33, %v994_v58  ;;  %v1351_v51 = vadd.f32 %v1198_v0, %v889_v23  ;;  %v612_v4 = vadd.f32 %v580_v59, %v544_v40  ;;  %v752_v5 = vmul.f32 %v1771_v19, %v2167_v52 }
  0x72   : > { %1415 = vst.msk [vmem:[%s1846_s12 + $0x78] sm:$0xff] %vm1399_vm2, %v1382_v45  ;;  %v1263_v6 = vrot.slane %v1061_v62, 1  ;;  %v820_v7 = vmul.f32 %v1773_v20, %v2219_v47  ;;  %v545_v9 = vmul.f32 %v1760_v12, %v2146_v31  ;;  %v581_v57 = vmul.f32 %v1762_v13, %v2198_v63 }
  0x73   : > { %v1264_v10 = vrot.slane %v1062_v2, 1  ;;  %v680_v17 = vadd.f32 %v648_v60, %v612_v4  ;;  %v784_v18 = vadd.f32 %v752_v5, %v716_v1  ;;  %v649_v24 = vmul.f32 %v1764_v14, %v2250_v56 }
  0x74   : > { %v613_v61 = vadd.f32 %v581_v57, %v545_v9  ;;  %v717_v25 = vmul.f32 %v1766_v15, %v2146_v31  ;;  %v753_v27 = vmul.f32 %v1771_v19, %v2198_v63  ;;  %v821_v29 = vmul.f32 %v1773_v20, %v2250_v56 }
  0x75   : > { %v1265_v32 = vsel %vm1238_vm1, %v1263_v6, %v1264_v10  ;;  %v852_v3 = vadd.f32 %v820_v7, %v784_v18  ;;  %v1135_v16 = vrot.slane %v680_v17, 7  ;;  %v1327_v34 = vsel %vm1238_vm1, %v1264_v10, 0.0 }
  0x76   : > { %v1383_v35 = vadd.f32 %v1351_v51, %v1265_v32  ;;  %v681_v11 = vadd.f32 %v649_v24, %v613_v61  ;;  %v785_v8 = vadd.f32 %v753_v27, %v717_v25  ;;  %v927_v37 = vmul.f32 %v1775_v21, %v2146_v31  ;;  %v2302_v51 = vld [vmem:[%s1751_s27 + $0xb0] sm:$0xff] }
  0x77   : > { %v890_v38 = vadd.f32 %v1816_v46, %v852_v3  ;;  %v1136_v39 = vsel %vm1109_vm0, %v1134_v55, %v1135_v16  ;;  %v928_v28 = vmul.f32 %v1775_v21, %v2167_v52  ;;  %v963_v42 = vmul.f32 %v1777_v22, %v2198_v63 }
  0x78   : > { %1416 = vst.msk [vmem:[%s1846_s12 + $0x80] sm:$0xff] %vm1399_vm2, %v1383_v35  ;;  %v853_v43 = vadd.f32 %v821_v29, %v785_v8  ;;  %v964_v44 = vmul.f32 %v1777_v22, %v2219_v47  ;;  %v1031_v31 = vmul.f32 %v1785_v26, %v2250_v56  ;;  %v1032_v30 = vmul.f32 %v1785_v26, %v2271_v41 }
  0x79   : > { %v1352_v48 = vadd.f32 %v1136_v39, %v890_v38  ;;  %v995_v49 = vadd.f32 %v963_v42, %v927_v37  ;;  %v1137_v50 = vrot.slane %v681_v11, 7  ;;  %v546_v36 = vmul.f32 %v1760_v12, %v2167_v52  ;;  %v2323_v11 = vld [vmem:[%s1751_s27 + $0xb8] sm:$0xff] }
  0x7a   : > { %v891_v33 = vadd.f32 %v1816_v46, %v853_v43  ;;  %v996_v53 = vadd.f32 %v964_v44, %v928_v28  ;;  %v582_v54 = vmul.f32 %v1762_v13, %v2219_v47  ;;  %v650_v55 = vmul.f32 %v1764_v14, %v2271_v41 }
  0x7b   : > { %v1384_v40 = vadd.f32 %v1352_v48, %v1327_v34  ;;  %v1063_v23 = vadd.f32 %v1031_v31, %v995_v49  ;;  %v1199_v58 = vsel %vm1109_vm0, 0.0, %v1137_v50  ;;  %v718_v59 = vmul.f32 %v1766_v15, %v2167_v52 }
  0x7c   : > { %v1064_v60 = vadd.f32 %v1032_v30, %v996_v53  ;;  %v1353_v45 = vadd.f32 %v1199_v58, %v891_v33  ;;  %v614_v62 = vadd.f32 %v582_v54, %v546_v36  ;;  %v754_v0 = vmul.f32 %v1771_v19, %v2219_v47 }
  0x7d   : > { %1417 = vst.msk [vmem:[%s1846_s12 + $0x88] sm:$0xff] %vm1399_vm2, %v1384_v40  ;;  %v1266_v1 = vrot.slane %v1063_v23, 1  ;;  %v822_v2 = vmul.f32 %v1773_v20, %v2271_v41  ;;  %v547_v4 = vmul.f32 %v1760_v12, %v2198_v63  ;;  %v583_v52 = vmul.f32 %v1762_v13, %v2250_v56 }
  0x7e   : > { %v1267_v5 = vrot.slane %v1064_v60, 1  ;;  %v682_v6 = vadd.f32 %v650_v55, %v614_v62  ;;  %v786_v7 = vadd.f32 %v754_v0, %v718_v59  ;;  %v651_v9 = vmul.f32 %v1764_v14, %v2302_v51  ;;  %v2354_v59 = vld [vmem:[%s1751_s27 + $0xc0] sm:$0xff] }
  0x7f   : > { %v615_v57 = vadd.f32 %v583_v52, %v547_v4  ;;  %v719_v10 = vmul.f32 %v1766_v15, %v2198_v63  ;;  %v755_v17 = vmul.f32 %v1771_v19, %v2250_v56  ;;  %v823_v18 = vmul.f32 %v1773_v20, %v2302_v51 }
  0x80   : > { %v1268_v24 = vsel %vm1238_vm1, %v1266_v1, %v1267_v5  ;;  %v854_v61 = vadd.f32 %v822_v2, %v786_v7  ;;  %v1138_v25 = vrot.slane %v682_v6, 7  ;;  %v1328_v27 = vsel %vm1238_vm1, %v1267_v5, 0.0 }
  0x81   : > { %v1385_v29 = vadd.f32 %v1353_v45, %v1268_v24  ;;  %v683_v32 = vadd.f32 %v651_v9, %v615_v57  ;;  %v787_v3 = vadd.f32 %v755_v17, %v719_v10  ;;  %v929_v16 = vmul.f32 %v1775_v21, %v2198_v63 }
  0x82   : > { %v892_v34 = vadd.f32 %v1816_v46, %v854_v61  ;;  %v1139_v35 = vsel %vm1109_vm0, %v1137_v50, %v1138_v25  ;;  %v930_v8 = vmul.f32 %v1775_v21, %v2219_v47  ;;  %v965_v37 = vmul.f32 %v1777_v22, %v2250_v56  ;;  %v2375_v61 = vld [vmem:[%s2636_s4] ss:$0 sm:$0xff] }
  0x83   : > { %1418 = vst.msk [vmem:[%s1846_s12 + $0x90] sm:$0xff] %vm1399_vm2, %v1385_v29  ;;  %v855_v38 = vadd.f32 %v823_v18, %v787_v3  ;;  %v966_v39 = vmul.f32 %v1777_v22, %v2271_v41  ;;  %v1033_v63 = vmul.f32 %v1785_v26, %v2302_v51  ;;  %v1034_v28 = vmul.f32 %v1785_v26, %v2323_v11  ;;  %v2380_v29 = vld [vmem:[%s1751_s27 + $0xc8] sm:$0xff] }
  0x84   : > { %v1354_v42 = vadd.f32 %v1139_v35, %v892_v34  ;;  %v997_v43 = vadd.f32 %v965_v37, %v929_v16  ;;  %v1140_v44 = vrot.slane %v683_v32, 7  ;;  %v548_v31 = vmul.f32 %v1760_v12, %v2219_v47  ;;  %v2393_v34 = vld [vmem:[%s2635_s3 + $0x8] ss:$0 sm:$0xff] }
  0x85   : > { %v893_v30 = vadd.f32 %v1816_v46, %v855_v38  ;;  %v998_v48 = vadd.f32 %v966_v39, %v930_v8  ;;  %v584_v49 = vmul.f32 %v1762_v13, %v2271_v41  ;;  %v652_v50 = vmul.f32 %v1764_v14, %v2323_v11 }
  0x86   : > { %v1386_v36 = vadd.f32 %v1354_v42, %v1328_v27  ;;  %v1065_v33 = vadd.f32 %v1033_v63, %v997_v43  ;;  %v1200_v26 = vsel %vm1109_vm0, 0.0, %v1140_v44  ;;  %v720_v53 = vmul.f32 %v1766_v15, %v2219_v47 }
  0x87   : > { %v1066_v54 = vadd.f32 %v1034_v28, %v998_v48  ;;  %v1355_v55 = vadd.f32 %v1200_v26, %v893_v30  ;;  %v616_v40 = vadd.f32 %v584_v49, %v548_v31  ;;  %v756_v46 = vmul.f32 %v1771_v19, %v2271_v41 }
  0x88   : > { %1419 = vst.msk [vmem:[%s1846_s12 + $0x98] sm:$0xff] %vm1399_vm2, %v1386_v36  ;;  %v1269_v23 = vrot.slane %v1065_v33, 1  ;;  %v824_v58 = vmul.f32 %v1773_v20, %v2323_v11  ;;  %v549_v60 = vmul.f32 %v1760_v12, %v2250_v56  ;;  %v585_v47 = vmul.f32 %v1762_v13, %v2302_v51 }
  0x89   : > { %v1270_v45 = vrot.slane %v1066_v54, 1  ;;  %v684_v62 = vadd.f32 %v652_v50, %v616_v40  ;;  %v788_v0 = vadd.f32 %v756_v46, %v720_v53  ;;  %v653_v1 = vmul.f32 %v1764_v14, %v2354_v59 }
  0x8a   : > { %v617_v2 = vadd.f32 %v585_v47, %v549_v60  ;;  %v721_v4 = vmul.f32 %v1766_v15, %v2250_v56  ;;  %v757_v52 = vmul.f32 %v1771_v19, %v2302_v51  ;;  %v825_v5 = vmul.f32 %v1773_v20, %v2354_v59 }
  0x8b   : > { %v1271_v6 = vsel %vm1238_vm1, %v1269_v23, %v1270_v45  ;;  %v856_v7 = vadd.f32 %v824_v58, %v788_v0  ;;  %v1141_v9 = vrot.slane %v684_v62, 7  ;;  %v1329_v57 = vsel %vm1238_vm1, %v1270_v45, 0.0 }
  0x8c   : > { %v1387_v10 = vadd.f32 %v1355_v55, %v1271_v6  ;;  %v685_v17 = vadd.f32 %v653_v1, %v617_v2  ;;  %v789_v18 = vadd.f32 %v757_v52, %v721_v4  ;;  %v931_v24 = vmul.f32 %v1775_v21, %v2250_v56  ;;  %v2416_v55 = vld [vmem:[%s1751_s27 + $0xd0] sm:$0xff] }
  0x8d   : > { %v894_v25 = vadd.f32 %v2375_v61, %v856_v7  ;;  %v1142_v27 = vsel %vm1109_vm0, %v1140_v44, %v1141_v9  ;;  %v932_v32 = vmul.f32 %v1775_v21, %v2271_v41  ;;  %v967_v3 = vmul.f32 %v1777_v22, %v2302_v51 }
  0x8e   : > { %1420 = vst.msk [vmem:[%s1846_s12 + $0xa0] sm:$0xff] %vm1399_vm2, %v1387_v10  ;;  %v857_v56 = vadd.f32 %v825_v5, %v789_v18  ;;  %v968_v16 = vmul.f32 %v1777_v22, %v2323_v11  ;;  %v1035_v35 = vmul.f32 %v2393_v34, %v2354_v59  ;;  %v1036_v8 = vmul.f32 %v2393_v34, %v2380_v29 }
  0x8f   : > { %v1356_v37 = vadd.f32 %v1142_v27, %v894_v25  ;;  %v999_v38 = vadd.f32 %v967_v3, %v931_v24  ;;  %v1143_v39 = vrot.slane %v685_v17, 7  ;;  %v550_v63 = vmul.f32 %v1760_v12, %v2271_v41  ;;  %v2437_v17 = vld [vmem:[%s1751_s27 + $0xd8] sm:$0xff] }
  0x90   : > { %v895_v28 = vadd.f32 %v2375_v61, %v857_v56  ;;  %v1000_v42 = vadd.f32 %v968_v16, %v932_v32  ;;  %v586_v43 = vmul.f32 %v1762_v13, %v2323_v11  ;;  %v654_v44 = vmul.f32 %v1764_v14, %v2380_v29 }
  0x91   : > { %v1388_v31 = vadd.f32 %v1356_v37, %v1329_v57  ;;  %v1067_v30 = vadd.f32 %v1035_v35, %v999_v38  ;;  %v1201_v48 = vsel %vm1109_vm0, 0.0, %v1143_v39  ;;  %v722_v49 = vmul.f32 %v1766_v15, %v2271_v41 }
  0x92   : > { %v1068_v50 = vadd.f32 %v1036_v8, %v1000_v42  ;;  %v1357_v36 = vadd.f32 %v1201_v48, %v895_v28  ;;  %v618_v33 = vadd.f32 %v586_v43, %v550_v63  ;;  %v758_v26 = vmul.f32 %v1771_v19, %v2323_v11 }
  0x93   : > { %1421 = vst.msk [vmem:[%s1846_s12 + $0xa8] sm:$0xff] %vm1399_vm2, %v1388_v31  ;;  %v1272_v53 = vrot.slane %v1067_v30, 1  ;;  %v826_v54 = vmul.f32 %v1773_v20, %v2380_v29  ;;  %v551_v40 = vmul.f32 %v1760_v12, %v2302_v51  ;;  %v587_v41 = vmul.f32 %v1762_v13, %v2354_v59 }
  0x94   : > { %v1273_v46 = vrot.slane %v1068_v50, 1  ;;  %v686_v23 = vadd.f32 %v654_v44, %v618_v33  ;;  %v790_v58 = vadd.f32 %v758_v26, %v722_v49  ;;  %v655_v60 = vmul.f32 %v1764_v14, %v2416_v55 }
  0x95   : > { %v619_v47 = vadd.f32 %v587_v41, %v551_v40  ;;  %v723_v45 = vmul.f32 %v1766_v15, %v2302_v51  ;;  %v759_v62 = vmul.f32 %v1771_v19, %v2354_v59  ;;  %v827_v0 = vmul.f32 %v1773_v20, %v2416_v55 }
  0x96   : > { %v1274_v1 = vsel %vm1238_vm1, %v1272_v53, %v1273_v46  ;;  %v858_v2 = vadd.f32 %v826_v54, %v790_v58  ;;  %v1144_v4 = vrot.slane %v686_v23, 7  ;;  %v1330_v52 = vsel %vm1238_vm1, %v1273_v46, 0.0 }
  0x97   : > { %v1389_v5 = vadd.f32 %v1357_v36, %v1274_v1  ;;  %v687_v6 = vadd.f32 %v655_v60, %v619_v47  ;;  %v791_v7 = vadd.f32 %v759_v62, %v723_v45  ;;  %v933_v9 = vmul.f32 %v1775_v21, %v2302_v51  ;;  %v2468_v36 = vld [vmem:[%s1751_s27 + $0xe0] sm:$0xff] }
  0x98   : > { %v896_v57 = vadd.f32 %v2375_v61, %v858_v2  ;;  %v1145_v10 = vsel %vm1109_vm0, %v1143_v39, %v1144_v4  ;;  %v934_v18 = vmul.f32 %v1775_v21, %v2323_v11  ;;  %v969_v24 = vmul.f32 %v1777_v22, %v2354_v59 }
  0x99   : > { %1422 = vst.msk [vmem:[%s1846_s12 + $0xb0] sm:$0xff] %vm1399_vm2, %v1389_v5  ;;  %v859_v25 = vadd.f32 %v827_v0, %v791_v7  ;;  %v970_v27 = vmul.f32 %v1777_v22, %v2380_v29  ;;  %v1037_v51 = vmul.f32 %v2393_v34, %v2416_v55  ;;  %v1038_v32 = vmul.f32 %v2393_v34, %v2437_v17 }
  0x9a   : > { %v1358_v3 = vadd.f32 %v1145_v10, %v896_v57  ;;  %v1001_v56 = vadd.f32 %v969_v24, %v933_v9  ;;  %v1146_v16 = vrot.slane %v687_v6, 7  ;;  %v552_v35 = vmul.f32 %v1760_v12, %v2323_v11  ;;  %v2489_v6 = vld [vmem:[%s1751_s27 + $0xe8] sm:$0xff] }
  0x9b   : > { %v897_v8 = vadd.f32 %v2375_v61, %v859_v25  ;;  %v1002_v37 = vadd.f32 %v970_v27, %v934_v18  ;;  %v588_v38 = vmul.f32 %v1762_v13, %v2380_v29  ;;  %v656_v39 = vmul.f32 %v1764_v14, %v2437_v17 }
  0x9c   : > { %v1390_v63 = vadd.f32 %v1358_v3, %v1330_v52  ;;  %v1069_v28 = vadd.f32 %v1037_v51, %v1001_v56  ;;  %v1202_v42 = vsel %vm1109_vm0, 0.0, %v1146_v16  ;;  %v724_v43 = vmul.f32 %v1766_v15, %v2323_v11 }
  0x9d   : > { %v1070_v44 = vadd.f32 %v1038_v32, %v1002_v37  ;;  %v1359_v31 = vadd.f32 %v1202_v42, %v897_v8  ;;  %v620_v30 = vadd.f32 %v588_v38, %v552_v35  ;;  %v760_v48 = vmul.f32 %v1771_v19, %v2380_v29 }
  0x9e   : > { %1423 = vst.msk [vmem:[%s1846_s12 + $0xb8] sm:$0xff] %vm1399_vm2, %v1390_v63  ;;  %v1275_v49 = vrot.slane %v1069_v28, 1  ;;  %v828_v50 = vmul.f32 %v1773_v20, %v2437_v17  ;;  %v553_v33 = vmul.f32 %v1760_v12, %v2354_v59  ;;  %v589_v11 = vmul.f32 %v1762_v13, %v2416_v55 }
  0x9f   : > { %v1276_v26 = vrot.slane %v1070_v44, 1  ;;  %v688_v53 = vadd.f32 %v656_v39, %v620_v30  ;;  %v792_v54 = vadd.f32 %v760_v48, %v724_v43  ;;  %v657_v40 = vmul.f32 %v1764_v14, %v2468_v36 }
  0xa0   : > { %v621_v41 = vadd.f32 %v589_v11, %v553_v33  ;;  %v725_v46 = vmul.f32 %v1766_v15, %v2354_v59  ;;  %v761_v23 = vmul.f32 %v1771_v19, %v2416_v55  ;;  %v829_v58 = vmul.f32 %v1773_v20, %v2468_v36 }
  0xa1   : > { %v1277_v60 = vsel %vm1238_vm1, %v1275_v49, %v1276_v26  ;;  %v860_v47 = vadd.f32 %v828_v50, %v792_v54  ;;  %v1147_v45 = vrot.slane %v688_v53, 7  ;;  %v1331_v62 = vsel %vm1238_vm1, %v1276_v26, 0.0 }
  0xa2   : > { %v1391_v0 = vadd.f32 %v1359_v31, %v1277_v60  ;;  %v689_v1 = vadd.f32 %v657_v40, %v621_v41  ;;  %v793_v2 = vadd.f32 %v761_v23, %v725_v46  ;;  %v935_v4 = vmul.f32 %v1775_v21, %v2354_v59  ;;  %v2520_v31 = vld [vmem:[%s1751_s27 + $0xf0] sm:$0xff] }
  0xa3   : > { %v898_v52 = vadd.f32 %v2375_v61, %v860_v47  ;;  %v1148_v5 = vsel %vm1109_vm0, %v1146_v16, %v1147_v45  ;;  %v936_v7 = vmul.f32 %v1775_v21, %v2380_v29  ;;  %v971_v9 = vmul.f32 %v1777_v22, %v2416_v55 }
  0xa4   : > { %1424 = vst.msk [vmem:[%s1846_s12 + $0xc0] sm:$0xff] %vm1399_vm2, %v1391_v0  ;;  %v861_v57 = vadd.f32 %v829_v58, %v793_v2  ;;  %v972_v10 = vmul.f32 %v1777_v22, %v2437_v17  ;;  %v1039_v59 = vmul.f32 %v2393_v34, %v2468_v36  ;;  %v1040_v18 = vmul.f32 %v2393_v34, %v2489_v6 }
  0xa5   : > { %v1360_v24 = vadd.f32 %v1148_v5, %v898_v52  ;;  %v1003_v25 = vadd.f32 %v971_v9, %v935_v4  ;;  %v1149_v27 = vrot.slane %v689_v1, 7  ;;  %v554_v51 = vmul.f32 %v1760_v12, %v2380_v29  ;;  %v2542_v1 = vld [vmem:[%s1751_s27 + $0xf8] sm:$0xff] }
  0xa6   : > { %v899_v32 = vadd.f32 %v2375_v61, %v861_v57  ;;  %v1004_v3 = vadd.f32 %v972_v10, %v936_v7  ;;  %v590_v56 = vmul.f32 %v1762_v13, %v2437_v17  ;;  %v658_v16 = vmul.f32 %v1764_v14, %v2489_v6 }
  0xa7   : > { %v1392_v35 = vadd.f32 %v1360_v24, %v1331_v62  ;;  %v1071_v8 = vadd.f32 %v1039_v59, %v1003_v25  ;;  %v1203_v37 = vsel %vm1109_vm0, 0.0, %v1149_v27  ;;  %v726_v38 = vmul.f32 %v1766_v15, %v2380_v29 }
  0xa8   : > { %v1072_v39 = vadd.f32 %v1040_v18, %v1004_v3  ;;  %v1361_v63 = vadd.f32 %v1203_v37, %v899_v32  ;;  %v622_v28 = vadd.f32 %v590_v56, %v554_v51  ;;  %v762_v42 = vmul.f32 %v1771_v19, %v2437_v17  ;;  %v512_v51 = vld [vmem:[%s446_s23] sm:$0xff]  ;;  %v513_v32 = vld [vmem:[%s446_s23 + $0x8] sm:$0xff] }
  0xa9   : > { %1425 = vst.msk [vmem:[%s1846_s12 + $0xc8] sm:$0xff] %vm1399_vm2, %v1392_v35  ;;  %v1278_v43 = vrot.slane %v1071_v8, 1  ;;  %v830_v44 = vmul.f32 %v1773_v20, %v2489_v6  ;;  %v555_v30 = vmul.f32 %v1760_v12, %v2416_v55  ;;  %v591_v29 = vmul.f32 %v1762_v13, %v2468_v36 }
  0xaa   : > { %v1279_v48 = vrot.slane %v1072_v39, 1  ;;  %v690_v49 = vadd.f32 %v658_v16, %v622_v28  ;;  %v794_v50 = vadd.f32 %v762_v42, %v726_v38  ;;  %v659_v33 = vmul.f32 %v1764_v14, %v2520_v31 }
  0xab   : > { %v623_v11 = vadd.f32 %v591_v29, %v555_v30  ;;  %v727_v26 = vmul.f32 %v1766_v15, %v2416_v55  ;;  %v763_v53 = vmul.f32 %v1771_v19, %v2468_v36  ;;  %v831_v54 = vmul.f32 %v1773_v20, %v2520_v31 }
  0xac   : > { %v1280_v40 = vsel %vm1238_vm1, %v1278_v43, %v1279_v48  ;;  %v862_v41 = vadd.f32 %v830_v44, %v794_v50  ;;  %v1150_v46 = vrot.slane %v690_v49, 7  ;;  %v1332_v23 = vsel %vm1238_vm1, %v1279_v48, 0.0 }
  0xad   : > { %v1393_v58 = vadd.f32 %v1361_v63, %v1280_v40  ;;  %v691_v60 = vadd.f32 %v659_v33, %v623_v11  ;;  %v795_v47 = vadd.f32 %v763_v53, %v727_v26  ;;  %v937_v45 = vmul.f32 %v1775_v21, %v2416_v55 }
  0xae   : > { %v900_v62 = vadd.f32 %v2375_v61, %v862_v41  ;;  %v1151_v0 = vsel %vm1109_vm0, %v1149_v27, %v1150_v46  ;;  %v938_v2 = vmul.f32 %v1775_v21, %v2437_v17  ;;  %v973_v4 = vmul.f32 %v1777_v22, %v2468_v36 }
  0xaf   : > { %1426 = vst.msk [vmem:[%s1846_s12 + $0xd0] sm:$0xff] %vm1399_vm2, %v1393_v58  ;;  %v863_v52 = vadd.f32 %v831_v54, %v795_v47  ;;  %v974_v55 = vmul.f32 %v1777_v22, %v2489_v6  ;;  %v1041_v5 = vmul.f32 %v2393_v34, %v2520_v31  ;;  %v1042_v7 = vmul.f32 %v2393_v34, %v2542_v1 }
  0xb0   : > { %v1362_v9 = vadd.f32 %v1151_v0, %v900_v62  ;;  %v1005_v57 = vadd.f32 %v973_v4, %v937_v45  ;;  %v1152_v10 = vrot.slane %v691_v60, 7  ;;  %v556_v59 = vmul.f32 %v1760_v12, %v2437_v17 }
  0xb1   : > { %v901_v18 = vadd.f32 %v2375_v61, %v863_v52  ;;  %v1006_v24 = vadd.f32 %v974_v55, %v938_v2  ;;  %v592_v25 = vmul.f32 %v1762_v13, %v2489_v6  ;;  %v660_v27 = vmul.f32 %v1764_v14, %v2542_v1 }
  0xb2   : > { %v1394_v3 = vadd.f32 %v1362_v9, %v1332_v23  ;;  %v1073_v56 = vadd.f32 %v1041_v5, %v1005_v57  ;;  %v1204_v16 = vsel %vm1109_vm0, 0.0, %v1152_v10  ;;  %v728_v35 = vmul.f32 %v1766_v15, %v2437_v17 }
  0xb3   : > { %v1074_v8 = vadd.f32 %v1042_v7, %v1006_v24  ;;  %v1363_v37 = vadd.f32 %v1204_v16, %v901_v18  ;;  %v624_v38 = vadd.f32 %v592_v25, %v556_v59  ;;  %v764_v39 = vmul.f32 %v1771_v19, %v2489_v6 }
  0xb4   : > { %1427 = vst.msk [vmem:[%s1846_s12 + $0xd8] sm:$0xff] %vm1399_vm2, %v1394_v3  ;;  %v1281_v63 = vrot.slane %v1073_v56, 1  ;;  %v832_v28 = vmul.f32 %v1773_v20, %v2542_v1  ;;  %v518_v42 = vmul.f32 0.0, %v512_v51  ;;  %v519_v43 = vmul.f32 0.0, %v513_v32 }
  0xb5   : > { %v1282_v44 = vrot.slane %v1074_v8, 1  ;;  %v692_v30 = vadd.f32 %v660_v27, %v624_v38  ;;  %v796_v29 = vadd.f32 %v764_v39, %v728_v35  ;;  %v557_v17 = vmul.f32 %v1760_v12, %v2468_v36 }
  0xb6   : > { %v593_v48 = vmul.f32 %v1762_v13, %v2520_v31  ;;  %v661_v49 = vmul.f32 %v1764_v14, %v518_v42  ;;  %v729_v50 = vmul.f32 %v1766_v15, %v2468_v36  ;;  %v765_v33 = vmul.f32 %v1771_v19, %v2520_v31 }
  0xb7   : > { %v1283_v11 = vsel %vm1238_vm1, %v1281_v63, %v1282_v44  ;;  %v864_v26 = vadd.f32 %v832_v28, %v796_v29  ;;  %v1153_v53 = vrot.slane %v692_v30, 7  ;;  %v1333_v54 = vsel %vm1238_vm1, %v1282_v44, 0.0 }
  0xb8   : > { %v1395_v40 = vadd.f32 %v1363_v37, %v1283_v11  ;;  %v625_v41 = vadd.f32 %v593_v48, %v557_v17  ;;  %v797_v46 = vadd.f32 %v765_v33, %v729_v50  ;;  %v833_v23 = vmul.f32 %v1773_v20, %v518_v42 }
  0xb9   : > { %v902_v58 = vadd.f32 %v2375_v61, %v864_v26  ;;  %v1154_v60 = vsel %vm1109_vm0, %v1152_v10, %v1153_v53  ;;  %v939_v47 = vmul.f32 %v1775_v21, %v2468_v36  ;;  %v940_v45 = vmul.f32 %v1775_v21, %v2489_v6 }
  0xba   : > { %1428 = vst.msk [vmem:[%s1846_s12 + $0xe0] sm:$0xff] %vm1399_vm2, %v1395_v40  ;;  %v693_v62 = vadd.f32 %v661_v49, %v625_v41  ;;  %v865_v0 = vadd.f32 %v833_v23, %v797_v46  ;;  %v975_v2 = vmul.f32 %v1777_v22, %v2520_v31  ;;  %v976_v4 = vmul.f32 %v1777_v22, %v2542_v1 }
  0xbb   : > { %v1364_v52 = vadd.f32 %v1154_v60, %v902_v58  ;;  %v1043_v55 = vmul.f32 %v2393_v34, %v518_v42  ;;  %v1044_v5 = vmul.f32 %v2393_v34, %v519_v43  ;;  %v558_v36 = vmul.f32 %v1760_v12, %v2489_v6 }
  0xbc   : > { %v903_v21 = vadd.f32 %v2375_v61, %v865_v0  ;;  %v1007_v7 = vadd.f32 %v975_v2, %v939_v47  ;;  %v1008_v9 = vadd.f32 %v976_v4, %v940_v45  ;;  %v1155_v57 = vrot.slane %v693_v62, 7 }
  0xbd   : > { %v1396_v10 = vadd.f32 %v1364_v52, %v1333_v54  ;;  %v594_v31 = vmul.f32 %v1762_v13, %v2542_v1  ;;  %v662_v22 = vmul.f32 %v1764_v14, %v519_v43  ;;  %v730_v59 = vmul.f32 %v1766_v15, %v2489_v6 }
  0xbe   : > { %v1075_v18 = vadd.f32 %v1043_v55, %v1007_v7  ;;  %v1076_v24 = vadd.f32 %v1044_v5, %v1008_v9  ;;  %v1205_v34 = vsel %vm1109_vm0, 0.0, %v1155_v57  ;;  %v766_v12 = vmul.f32 %v1771_v19, %v2542_v1 }
  0xbf   : > { %1429 = vst.msk [vmem:[%s1846_s12 + $0xe8] sm:$0xff] %vm1399_vm2, %v1396_v10  ;;  %v1365_v25 = vadd.f32 %v1205_v34, %v903_v21  ;;  %v626_v27 = vadd.f32 %v594_v31, %v558_v36  ;;  %v834_v13 = vmul.f32 %v1773_v20, %v519_v43 }
  0xc0   : > { %v1284_v51 = vrot.slane %v1075_v18, 1  ;;  %v1285_v14 = vrot.slane %v1076_v24, 1  ;;  %v798_v32 = vadd.f32 %v766_v12, %v730_v59 }
  0xc1   : > { %v694_v3 = vadd.f32 %v662_v22, %v626_v27 }
  0xc2   : > { %v1286_v15 = vsel %vm1238_vm1, %v1284_v51, %v1285_v14  ;;  %v866_v6 = vadd.f32 %v834_v13, %v798_v32  ;;  %v1334_v1 = vsel %vm1238_vm1, %v1285_v14, 0.0 }
  0xc3   : > { %v1397_v56 = vadd.f32 %v1365_v25, %v1286_v15  ;;  %v1156_v16 = vrot.slane %v694_v3, 7 }
  0xc4   : > { %v904_v35 = vadd.f32 %v2375_v61, %v866_v6 }
  0xc5   : > { %1430 = vst.msk [vmem:[%s1846_s12 + $0xf0] sm:$0xff] %vm1399_vm2, %v1397_v56  ;;  %v1157_v19 = vsel %vm1109_vm0, %v1155_v57, %v1156_v16 }
  0xc6   : > { %v1366_v8 = vadd.f32 %v1157_v19, %v904_v35 }
  0xc8   : > { %v1398_v37 = vadd.f32 %v1366_v8, %v1334_v1 }
  0xca   : > { %1431 = vst.msk [vmem:[%s1846_s12 + $0xf8] sm:$0xff] %vm1399_vm2, %v1398_v37 }
  0xcb PF: > { %s15_s20 = sadd.s32 1, %s1692_s20   ;;  %s2638_s18 = smov %s1688_s19 }
  0xcc   : > { %p12_p5 = scmp.ge.s32.totalorder %s15_s20, 4   ;;  %s2639_s19 = smov %s2641_s21 }
  0xce   :  { %14 = sbr.rel (!%p12_p5) target bundleno = 2 (0x2), region = 82 }

</bundles_post_ra>
